<compile_context>
chip_gen: v7x
topology: tpu7x:2x2x1
jax: 0.10.0
libtpu: 0.0.40
codegen_flags: <defaults>
</compile_context>

<pallas_src>
import jax
import jax.numpy as jnp
from jax.experimental import pallas as pl
from jax.experimental.pallas import tpu as pltpu


_PAD = 128       # lane-width padding for every layer
_N_LAYERS = 6    # 3 trunk layers + 3 fused-head layers


def nav_kernel(x_ref, w_ref, b_ref, out_ref):
    h = x_ref[...]                                            # (tb, 128) f32; lanes >= 12 are zero
    # Layers 0..4: Linear + ReLU (padded lanes stay exactly zero through ReLU).
    for l in range(_N_LAYERS - 1):
        y = jnp.dot(h, w_ref[l], preferred_element_type=jnp.float32) + b_ref[l]
        h = jnp.maximum(y, 0.0)
    # Layer 5: fused block-diagonal head -> col 0 = L logit, col 1 = delta_theta logit.
    y = jnp.dot(h, w_ref[_N_LAYERS - 1],
                preferred_element_type=jnp.float32) + b_ref[_N_LAYERS - 1]
    y2 = y[:, :2]                                             # (tb, 2)
    lane = jax.lax.broadcasted_iota(jnp.int32, y2.shape, 1)
    out_ref[...] = jnp.where(lane == 0, jax.nn.sigmoid(y2), jnp.tanh(y2))


def _round_up(x, m):
    return (x + m - 1) // m * m


def _block_diag(a, b):
    ra, ca = a.shape
    rb, cb = b.shape
    out = jnp.zeros((ra + rb, ca + cb), a.dtype)
    out = out.at[:ra, :ca].set(a)
    out = out.at[ra:, ca:].set(b)
    return out


def pack_params(params):
    """Fuse the two heads into block-diagonal layers and zero-pad every layer to 128x128.

    Runs once on the host side (not per kernel call). Returns:
      w_stack: (6, 128, 128) f32, b_stack: (6, 1, 128) f32.
    """
    (w1, b1, w2, b2, w3, b3,
     lw1, lb1, lw2, lb2, lw3, lb3,
     aw1, ab1, aw2, ab2, aw3, ab3) = params

    hw1 = jnp.concatenate([lw1, aw1], axis=1)   # (64, 64)
    hb1 = jnp.concatenate([lb1, ab1], axis=1)   # (1, 64)
    hw2 = _block_diag(lw2, aw2)                 # (64, 32)
    hb2 = jnp.concatenate([lb2, ab2], axis=1)   # (1, 32)
    hw3 = _block_diag(lw3, aw3)                 # (32, 2): col 0 = L, col 1 = delta_theta
    hb3 = jnp.concatenate([lb3, ab3], axis=1)   # (1, 2)

    layers = [(w1, b1), (w2, b2), (w3, b3), (hw1, hb1), (hw2, hb2), (hw3, hb3)]
    w_stack = jnp.zeros((_N_LAYERS, _PAD, _PAD), jnp.float32)
    b_stack = jnp.zeros((_N_LAYERS, 1, _PAD), jnp.float32)
    for l, (w, b) in enumerate(layers):
        din, dout = w.shape
        w_stack = w_stack.at[l, :din, :dout].set(w)
        b_stack = b_stack.at[l, :, :dout].set(b)
    return w_stack, b_stack


def navigation_net_forward(x, w_stack, b_stack, *, tile_b=256):
    """Forward pass. x: (B, 12) f32. Returns (B, 2) = [L, delta_theta]."""
    B, F = x.shape
    assert F == 12
    P = w_stack.shape[-1]

    # Large batch tile (amortizes the ~600-cycle per-grid-step overhead); keep it a
    # multiple of 8 sublanes; pad B up to a multiple of the tile with zero rows.
    # Callers with very large B should keep tile_b <= B//2 so the parallel grid axis has
    # >= 2 steps for v7x megacore sharding.
    tb = _round_up(min(tile_b, _round_up(B, 8)), 8)
    b_pad = _round_up(B, tb)

    x_pad = jnp.zeros((b_pad, P), jnp.float32).at[:B, :F].set(x.astype(jnp.float32))

    grid_spec = pltpu.PrefetchScalarGridSpec(
        num_scalar_prefetch=0,
        grid=(b_pad // tb,),
        in_specs=[
            pl.BlockSpec((tb, P), lambda i: (i, 0)),
            # Constant block index -> params stay resident in VMEM across all grid steps.
            pl.BlockSpec(w_stack.shape, lambda i: (0, 0, 0)),
            pl.BlockSpec(b_stack.shape, lambda i: (0, 0, 0)),
        ],
        out_specs=pl.BlockSpec((tb, 2), lambda i: (i, 0)),
    )
    out = pl.pallas_call(
        nav_kernel,
        out_shape=jax.ShapeDtypeStruct((b_pad, 2), jnp.float32),
        grid_spec=grid_spec,
        compiler_params=pltpu.CompilerParams(dimension_semantics=("parallel",)),
    )(x_pad, w_stack, b_stack)
    return out[:B]


def init_params(key):
    """Deterministic synthetic parameters; weights stored as (in, out), biases (1, out)."""
    dims_trunk = [(12, 16), (16, 32), (32, 64)]
    dims_head = [(64, 32), (32, 16), (16, 1)]
    params = []
    for (din, dout) in dims_trunk + dims_head + dims_head:
        key, kw, kb = jax.random.split(key, 3)
        bound = 1.0 / jnp.sqrt(din)
        w = jax.random.uniform(kw, (din, dout), jnp.float32, -bound, bound)
        b = jax.random.uniform(kb, (1, dout), jnp.float32, -bound, bound)
        params += [w, b]
    return params


def reference_forward(x, params):
    (w1, b1, w2, b2, w3, b3,
     lw1, lb1, lw2, lb2, lw3, lb3,
     aw1, ab1, aw2, ab2, aw3, ab3) = params
    relu = lambda v: jnp.maximum(v, 0.0)
    h = relu(x @ w1 + b1)
    h = relu(h @ w2 + b2)
    f = relu(h @ w3 + b3)
    lh = relu(relu(f @ lw1 + lb1) @ lw2 + lb2)
    L = jax.nn.sigmoid(lh @ lw3 + lb3)
    ah = relu(relu(f @ aw1 + ab1) @ aw2 + ab2)
    dt = jnp.tanh(ah @ aw3 + ab3)
    return jnp.concatenate([L, dt], axis=-1)


if __name__ == "__main__":
    key = jax.random.PRNGKey(0)
    key, kx = jax.random.split(key)
    B = 200                                   # deliberately not a multiple of the tile
    x = jax.random.normal(kx, (B, 12), jnp.float32)
    params = init_params(key)
    w_stack, b_stack = pack_params(params)    # one-time host-side packing

    out = navigation_net_forward(x, w_stack, b_stack, tile_b=128)  # grid = 2 parallel steps
    out = jax.block_until_ready(out)

    ref = reference_forward(x, params)
    assert out.shape == (B, 2)
    assert jnp.allclose(out, ref, atol=1e-5, rtol=1e-5), "mismatch vs reference"
    print("KERNEL_OK")
</pallas_src>

<mosaic_0001>
module attributes {stable_mosaic.version = 11 : i64} {
  func.func @nav_kernel(%arg0: i32, %arg1: memref<128x128xf32, #tpu.memory_space<vmem>>, %arg2: memref<6x128x128xf32, #tpu.memory_space<vmem>>, %arg3: memref<6x1x128xf32, #tpu.memory_space<vmem>>, %arg4: memref<128x2xf32, #tpu.memory_space<vmem>>) attributes {dimension_semantics = [#tpu.dimension_semantics<parallel>], iteration_bounds = array<i64: 2>, scalar_prefetch = 0 : i64, scratch_operands = 0 : i64, tpu.core_type = #tpu.core_type<tc>, window_params = [{transform_indices = @transform_0, window_bounds = array<i64: 128, 128>}, {pipeline_mode = #tpu.pipeline_mode<synchronous>, transform_indices = @transform_1, window_bounds = array<i64: 6, 128, 128>}, {pipeline_mode = #tpu.pipeline_mode<synchronous>, transform_indices = @transform_2, window_bounds = array<i64: 6, 1, 128>}, {transform_indices = @transform_3, window_bounds = array<i64: 128, 2>}]} {
    %c0 = arith.constant 0 : index
    %c0_0 = arith.constant 0 : index
    %0 = vector.load %arg1[%c0, %c0_0] : memref<128x128xf32, #tpu.memory_space<vmem>>, vector<128x128xf32>
    %c0_1 = arith.constant 0 : index
    %c0_2 = arith.constant 0 : index
    %c0_3 = arith.constant 0 : index
    %1 = vector.load %arg2[%c0_1, %c0_2, %c0_3] : memref<6x128x128xf32, #tpu.memory_space<vmem>>, vector<1x128x128xf32>
    %2 = vector.shape_cast %1 : vector<1x128x128xf32> to vector<128x128xf32>
    %cst = arith.constant dense<0.000000e+00> : vector<128x128xf32>
    %3 = tpu.matmul %0, %2, %cst {dimension_numbers = #tpu.dot_dimension_numbers<[1], [0], [0], [1], [0, 0, 1, 1], [], []>} : vector<128x128xf32>, vector<128x128xf32>, vector<128x128xf32> -> vector<128x128xf32>
    %c0_4 = arith.constant 0 : index
    %c0_5 = arith.constant 0 : index
    %c0_6 = arith.constant 0 : index
    %4 = vector.load %arg3[%c0_4, %c0_5, %c0_6] : memref<6x1x128xf32, #tpu.memory_space<vmem>>, vector<1x1x128xf32>
    %5 = vector.shape_cast %4 : vector<1x1x128xf32> to vector<1x128xf32>
    %6 = vector.broadcast %5 : vector<1x128xf32> to vector<128x128xf32>
    %7 = arith.addf %3, %6 : vector<128x128xf32>
    %cst_7 = arith.constant 0.000000e+00 : f32
    %8 = vector.broadcast %cst_7 : f32 to vector<128x128xf32>
    %9 = arith.maximumf %7, %8 : vector<128x128xf32>
    %c1 = arith.constant 1 : index
    %c0_8 = arith.constant 0 : index
    %c0_9 = arith.constant 0 : index
    %10 = vector.load %arg2[%c1, %c0_8, %c0_9] : memref<6x128x128xf32, #tpu.memory_space<vmem>>, vector<1x128x128xf32>
    %11 = vector.shape_cast %10 : vector<1x128x128xf32> to vector<128x128xf32>
    %cst_10 = arith.constant dense<0.000000e+00> : vector<128x128xf32>
    %12 = tpu.matmul %9, %11, %cst_10 {dimension_numbers = #tpu.dot_dimension_numbers<[1], [0], [0], [1], [0, 0, 1, 1], [], []>} : vector<128x128xf32>, vector<128x128xf32>, vector<128x128xf32> -> vector<128x128xf32>
    %c1_11 = arith.constant 1 : index
    %c0_12 = arith.constant 0 : index
    %c0_13 = arith.constant 0 : index
    %13 = vector.load %arg3[%c1_11, %c0_12, %c0_13] : memref<6x1x128xf32, #tpu.memory_space<vmem>>, vector<1x1x128xf32>
    %14 = vector.shape_cast %13 : vector<1x1x128xf32> to vector<1x128xf32>
    %15 = vector.broadcast %14 : vector<1x128xf32> to vector<128x128xf32>
    %16 = arith.addf %12, %15 : vector<128x128xf32>
    %cst_14 = arith.constant 0.000000e+00 : f32
    %17 = vector.broadcast %cst_14 : f32 to vector<128x128xf32>
    %18 = arith.maximumf %16, %17 : vector<128x128xf32>
    %c2 = arith.constant 2 : index
    %c0_15 = arith.constant 0 : index
    %c0_16 = arith.constant 0 : index
    %19 = vector.load %arg2[%c2, %c0_15, %c0_16] : memref<6x128x128xf32, #tpu.memory_space<vmem>>, vector<1x128x128xf32>
    %20 = vector.shape_cast %19 : vector<1x128x128xf32> to vector<128x128xf32>
    %cst_17 = arith.constant dense<0.000000e+00> : vector<128x128xf32>
    %21 = tpu.matmul %18, %20, %cst_17 {dimension_numbers = #tpu.dot_dimension_numbers<[1], [0], [0], [1], [0, 0, 1, 1], [], []>} : vector<128x128xf32>, vector<128x128xf32>, vector<128x128xf32> -> vector<128x128xf32>
    %c2_18 = arith.constant 2 : index
    %c0_19 = arith.constant 0 : index
    %c0_20 = arith.constant 0 : index
    %22 = vector.load %arg3[%c2_18, %c0_19, %c0_20] : memref<6x1x128xf32, #tpu.memory_space<vmem>>, vector<1x1x128xf32>
    %23 = vector.shape_cast %22 : vector<1x1x128xf32> to vector<1x128xf32>
    %24 = vector.broadcast %23 : vector<1x128xf32> to vector<128x128xf32>
    %25 = arith.addf %21, %24 : vector<128x128xf32>
    %cst_21 = arith.constant 0.000000e+00 : f32
    %26 = vector.broadcast %cst_21 : f32 to vector<128x128xf32>
    %27 = arith.maximumf %25, %26 : vector<128x128xf32>
    %c3 = arith.constant 3 : index
    %c0_22 = arith.constant 0 : index
    %c0_23 = arith.constant 0 : index
    %28 = vector.load %arg2[%c3, %c0_22, %c0_23] : memref<6x128x128xf32, #tpu.memory_space<vmem>>, vector<1x128x128xf32>
    %29 = vector.shape_cast %28 : vector<1x128x128xf32> to vector<128x128xf32>
    %cst_24 = arith.constant dense<0.000000e+00> : vector<128x128xf32>
    %30 = tpu.matmul %27, %29, %cst_24 {dimension_numbers = #tpu.dot_dimension_numbers<[1], [0], [0], [1], [0, 0, 1, 1], [], []>} : vector<128x128xf32>, vector<128x128xf32>, vector<128x128xf32> -> vector<128x128xf32>
    %c3_25 = arith.constant 3 : index
    %c0_26 = arith.constant 0 : index
    %c0_27 = arith.constant 0 : index
    %31 = vector.load %arg3[%c3_25, %c0_26, %c0_27] : memref<6x1x128xf32, #tpu.memory_space<vmem>>, vector<1x1x128xf32>
    %32 = vector.shape_cast %31 : vector<1x1x128xf32> to vector<1x128xf32>
    %33 = vector.broadcast %32 : vector<1x128xf32> to vector<128x128xf32>
    %34 = arith.addf %30, %33 : vector<128x128xf32>
    %cst_28 = arith.constant 0.000000e+00 : f32
    %35 = vector.broadcast %cst_28 : f32 to vector<128x128xf32>
    %36 = arith.maximumf %34, %35 : vector<128x128xf32>
    %c4 = arith.constant 4 : index
    %c0_29 = arith.constant 0 : index
    %c0_30 = arith.constant 0 : index
    %37 = vector.load %arg2[%c4, %c0_29, %c0_30] : memref<6x128x128xf32, #tpu.memory_space<vmem>>, vector<1x128x128xf32>
    %38 = vector.shape_cast %37 : vector<1x128x128xf32> to vector<128x128xf32>
    %cst_31 = arith.constant dense<0.000000e+00> : vector<128x128xf32>
    %39 = tpu.matmul %36, %38, %cst_31 {dimension_numbers = #tpu.dot_dimension_numbers<[1], [0], [0], [1], [0, 0, 1, 1], [], []>} : vector<128x128xf32>, vector<128x128xf32>, vector<128x128xf32> -> vector<128x128xf32>
    %c4_32 = arith.constant 4 : index
    %c0_33 = arith.constant 0 : index
    %c0_34 = arith.constant 0 : index
    %40 = vector.load %arg3[%c4_32, %c0_33, %c0_34] : memref<6x1x128xf32, #tpu.memory_space<vmem>>, vector<1x1x128xf32>
    %41 = vector.shape_cast %40 : vector<1x1x128xf32> to vector<1x128xf32>
    %42 = vector.broadcast %41 : vector<1x128xf32> to vector<128x128xf32>
    %43 = arith.addf %39, %42 : vector<128x128xf32>
    %cst_35 = arith.constant 0.000000e+00 : f32
    %44 = vector.broadcast %cst_35 : f32 to vector<128x128xf32>
    %45 = arith.maximumf %43, %44 : vector<128x128xf32>
    %c5 = arith.constant 5 : index
    %c0_36 = arith.constant 0 : index
    %c0_37 = arith.constant 0 : index
    %46 = vector.load %arg2[%c5, %c0_36, %c0_37] : memref<6x128x128xf32, #tpu.memory_space<vmem>>, vector<1x128x128xf32>
    %47 = vector.shape_cast %46 : vector<1x128x128xf32> to vector<128x128xf32>
    %cst_38 = arith.constant dense<0.000000e+00> : vector<128x128xf32>
    %48 = tpu.matmul %45, %47, %cst_38 {dimension_numbers = #tpu.dot_dimension_numbers<[1], [0], [0], [1], [0, 0, 1, 1], [], []>} : vector<128x128xf32>, vector<128x128xf32>, vector<128x128xf32> -> vector<128x128xf32>
    %c5_39 = arith.constant 5 : index
    %c0_40 = arith.constant 0 : index
    %c0_41 = arith.constant 0 : index
    %49 = vector.load %arg3[%c5_39, %c0_40, %c0_41] : memref<6x1x128xf32, #tpu.memory_space<vmem>>, vector<1x1x128xf32>
    %50 = vector.shape_cast %49 : vector<1x1x128xf32> to vector<1x128xf32>
    %51 = vector.broadcast %50 : vector<1x128xf32> to vector<128x128xf32>
    %52 = arith.addf %48, %51 : vector<128x128xf32>
    %53 = vector.extract_strided_slice %52 {offsets = [0, 0], sizes = [128, 2], strides = [1, 1]} : vector<128x128xf32> to vector<128x2xf32>
    %54 = tpu.iota {dimensions = array<i32: 1>} : vector<128x2xi32>
    %c0_i32 = arith.constant 0 : i32
    %55 = vector.broadcast %c0_i32 : i32 to vector<128x2xi32>
    %56 = arith.cmpi eq, %54, %55 : vector<128x2xi32>
    %57 = arith.negf %53 : vector<128x2xf32>
    %58 = math.exp %57 : vector<128x2xf32>
    %cst_42 = arith.constant 1.000000e+00 : f32
    %59 = vector.broadcast %cst_42 : f32 to vector<128x2xf32>
    %60 = arith.addf %59, %58 : vector<128x2xf32>
    %61 = arith.divf %59, %60 : vector<128x2xf32>
    %62 = math.tanh %53 : vector<128x2xf32>
    %63 = arith.select %56, %61, %62 : vector<128x2xi1>, vector<128x2xf32>
    %c0_43 = arith.constant 0 : index
    %c0_44 = arith.constant 0 : index
    %64 = vector.load %arg4[%c0_43, %c0_44] : memref<128x2xf32, #tpu.memory_space<vmem>>, vector<128x2xf32>
    tpu.vector_store %arg4[%c0_43, %c0_44], %63 {strides = array<i32>} : memref<128x2xf32, #tpu.memory_space<vmem>>, vector<128x2xf32>,
    return
  }
  func.func @transform_0(%arg0: i32) -> (i32, i32) {
    %c0_i32 = arith.constant 0 : i32
    %c0_i32_0 = arith.constant 0 : i32
    return %arg0, %c0_i32 : i32, i32
  }
  func.func @transform_1(%arg0: i32) -> (i32, i32, i32) {
    %c0_i32 = arith.constant 0 : i32
    %c0_i32_0 = arith.constant 0 : i32
    %c0_i32_1 = arith.constant 0 : i32
    %c0_i32_2 = arith.constant 0 : i32
    return %c0_i32, %c0_i32_0, %c0_i32_1 : i32, i32, i32
  }
  func.func @transform_2(%arg0: i32) -> (i32, i32, i32) {
    %c0_i32 = arith.constant 0 : i32
    %c0_i32_0 = arith.constant 0 : i32
    %c0_i32_1 = arith.constant 0 : i32
    %c0_i32_2 = arith.constant 0 : i32
    return %c0_i32, %c0_i32_0, %c0_i32_1 : i32, i32, i32
  }
  func.func @transform_3(%arg0: i32) -> (i32, i32) {
    %c0_i32 = arith.constant 0 : i32
    %c0_i32_0 = arith.constant 0 : i32
    return %arg0, %c0_i32 : i32, i32
  }
}

</mosaic_0001>

<bundles_post_ra>
// kernel: tpu_custom_call.1
= control target key start
LH: loop header
LB: loop body
LE: loop exit
PB: predicated region body
PF: predicated region fallthrough
CT: control target
= control target key end

     0   :  { %8 = vsyncpa [#allocation3], 0  ;;  %s2874_s0 = inlined_call_operand.hbm [shape: f32[256,128], index: 0, kind: input, shape index: {}]   ;;  %s2875_s1 = inlined_call_operand.hbm [shape: f32[6,128,128], index: 1, kind: input, shape index: {}]   ;;  %s2876_s2 = inlined_call_operand.vmem [shape: f32[6,1,128], index: 2, kind: input, shape index: {}]   ;;  %s2877_s3 = inlined_call_operand.vmem [shape: f32[256,2], index: 3, kind: output, shape index: {}]  }
   0x1   :  { %10 = vsyncpa [#allocation3 + $0x1], 0 }
   0x2   :  { %11 = vsyncpa [#allocation5], 0  ;;  %s2580_s12 = smov 0   ;;  %s2582_s13 = smov 0  }
   0x3   :  { %s2584_s14 = smov 0   ;;  %s2586_s15 = smov 0  }
   0x4 LB: > { %s1547_s16 = sadd.s32 4294967295, %s2554_s15   ;;  %p37_p0 = scmp.ne.s32.totalorder %s2546_s13, %s2542_s12  ;;  %s2554_s15 = sphi %s2586_s15, %s2893_s15   ;;  %s2550_s14 = sphi %s2584_s14, %s2892_s14   ;;  %s2546_s13 = sphi %s2582_s13, %s2891_s13   ;;  %s2542_s12 = sphi %s2580_s12, %s2890_s12  }
   0x5   : > { %p2602_p1 = scmp.eq.s32.totalorder %s1547_s16, 0  ;;  %p1549_p2 = scmp.ge.s32.totalorder %s2554_s15, 1 }
   0x6   : > { %p116_p3 = scmp.lt.s32.totalorder %s2554_s15, 3  ;;  %s2556_s20 = smov [#allocation4]  }
   0x7   : > { %s2882_s17 = scalar_select %p2602_p1, 1, 0 }
   0x8   : > { %p2610_p4 = por %p2602_p1, %p37_p0  ;;  %p2614_p5 = pnand %p1549_p2, %p116_p3 }
   0x9   : > { %s128_s21 = sshll.u32 %s2556_s20, 4  ;;  %s2627_s23 = sadd.s32 1, %s2554_s15   ;;  %s129_s21 = int_to_ptr.vmem [resolvable:$true] %s128_s21 }
   0xa   : > { %s2883_s18 = scalar_select %p2610_p4, 1, 0 }
   0xb   : > { %s2884_s19 = scalar_select %p2614_p5, 1, 0 }
   0xc   : > { %p2316_p6 = pneg %p2614_p5  ;;  %s24_s24 = sadd.s32 1, %s2550_s14 }
   0xd   : > { %s21_s25 = ssub.s32 %s2554_s15, %s2627_s23  ;;  %s2458_s28 = scalar_lea.hbm %s2875_s1, 12288 }
   0xe   : > { %p2622_p7 = pnand %p2316_p6, %p2602_p1  ;;  %p2459_p8 = scmp.ne.s32.totalorder %s2875_s1, %s2458_s28 }
   0xf   : > { %p2465_p12 = scmp.lt.u32.totalorder %s2458_s28, %s2875_s1 }
  0x10   : > { %p2460_p9 = pneg %p2622_p7 }
  0x12   : > { %p2461_p10 = pnand %p2460_p9, %p2459_p8 }
  0x14   : > { %p2462_p11 = pneg %p2461_p10 }
  0x16   : > { %p2467_p13 = pnand %p2465_p12, %p2462_p11 }
  0x18   : > { %2470 = shalt.err (!%p2467_p13)
}
  0x19   : > { %s2471_s6 = scalar_lea.vmem %s129_s21, 12288  ;;  %p2479_p6 = scmp.lt.s32.totalorder %s129_s21, %s129_s21 }
  0x1a   : > { %p2472_p0 = scmp.ne.s32.totalorder %s129_s21, %s2471_s6  ;;  %p2480_p1 = scmp.lt.s32.totalorder %s2471_s6, %s2471_s6 }
  0x1c   : > { %p2474_p2 = pnand %p2472_p0, %p2460_p9  ;;  %p2481_p4 = por %p2480_p1, %p2479_p6 }
  0x1e   : > { %p2475_p3 = pneg %p2474_p2 }
  0x20   : > { %p2482_p5 = pnand %p2481_p4, %p2475_p3 }
  0x22   : > { %2485 = shalt.err (!%p2482_p5)
}
  0x23   : > { %s2557_s7 = smov 128   ;;  %s2558_s8 = smov 8  }
  0x24   : > { %2319 = dma.hbm_to_vmem [thread:$0]  (!%p2622_p7), %s2875_s1, 12288, %s129_s21, [#allocation5], %s2557_s7, %s2557_s7, %s2558_s8  }
  0x25   : > { %p22_p1 = scmp.eq.s32.totalorder %s21_s25, 0  ;;  %p31_p4 = scmp.ne.s32.totalorder %s2550_s14, %s2546_s13 }
  0x26   : > { %p32_p5 = scmp.eq.s32.totalorder %s2554_s15, 0  ;;  %p2325_p8 = scmp.lt.s32.totalorder %s2554_s15, 2 }
  0x27   : > { %s2656_s11 = scalar_select %p22_p1, %s2550_s14, %s24_s24  }
  0x28   : > { %p33_p9 = por %p32_p5, %p31_p4  ;;  %s145_s12 = sand.u32 1, %s2550_s14  }
  0x29   : > { %s1552_s20 = sshll.u32 %s145_s12, 7  ;;  %s1589_s26 = sshll.u32 %s2554_s15, 11 }
  0x2a   : > { %s2663_s22 = scalar_lea.hbm %s2874_s0, %s1589_s26  ;;  %s149_s21 = scalar_lea.vmem [#allocation2], %s1552_s20 }
  0x2b   : > { %s156_s25 = sshll.u32 %s149_s21, 4  ;;  %p2667_p7 = pnand %p2325_p8, %p33_p9  ;;  %s2665_s25 = int_to_ptr.vmem [resolvable:$true] %s156_s25 }
  0x2c   : > { %s2671_s29 = scalar_lea.sflag [#allocation3], %s145_s12  ;;  %s2486_s30 = scalar_lea.hbm %s2663_s22, 2048 }
  0x2d   : > { %p2487_p10 = scmp.ne.s32.totalorder %s2663_s22, %s2486_s30  ;;  %p2488_p11 = pneg %p2667_p7 }
  0x2e   : > { %s2491_s6 = scalar_lea.hbm %s2874_s0, 4096  ;;  %p2492_p0 = scmp.lt.u32.totalorder %s2663_s22, %s2874_s0 }
  0x2f   : > { %p2489_p12 = pnand %p2488_p11, %p2487_p10  ;;  %p2493_p2 = scmp.lt.u32.totalorder %s2491_s6, %s2486_s30 }
  0x30   : > { %p2495_p6 = scmp.lt.u32.totalorder %s2486_s30, %s2663_s22 }
  0x31   : > { %p2490_p13 = pneg %p2489_p12  ;;  %p2494_p3 = por %p2493_p2, %p2492_p0 }
  0x33   : > { %p2496_p1 = por %p2495_p6, %p2494_p3 }
  0x35   : > { %p2497_p4 = pnand %p2496_p1, %p2490_p13 }
  0x37   : > { %2500 = shalt.err (!%p2497_p4)
}
  0x38   : > { %s2501_s12 = scalar_lea.vmem %s2665_s25, 2048  ;;  %s2559_s20 = smov [#allocation2]  }
  0x39   : > { %p2502_p5 = scmp.ne.s32.totalorder %s2665_s25, %s2501_s12  ;;  %s2506_s26 = sshll.u32 %s2559_s20, 4  ;;  %s2507_s26 = int_to_ptr.vmem [resolvable:$false] %s2506_s26 }
  0x3a   : > { %s2508_s27 = scalar_lea.vmem %s2507_s26, 4096  ;;  %p2509_p10 = scmp.lt.s32.totalorder %s2665_s25, %s2507_s26 }
  0x3b   : > { %p2504_p8 = pnand %p2502_p5, %p2488_p11  ;;  %p2510_p12 = scmp.lt.s32.totalorder %s2508_s27, %s2501_s12 }
  0x3d   : > { %p2505_p9 = pneg %p2504_p8  ;;  %p2511_p0 = por %p2510_p12, %p2509_p10 }
  0x3f   : > { %p2512_p2 = pnand %p2511_p0, %p2505_p9 }
  0x41   : > { %2515 = shalt.err (!%p2512_p2)
}
  0x42   : > { %2323 = dma.hbm_to_vmem [thread:$0]  (!%p2667_p7), %s2663_s22, 2048, %s2665_s25, %s2671_s29, %s2557_s7, %s2557_s7, %s2558_s8  }
  0x43   : > { %p2887_p11 = scmp.ne.s32.totalorder %s2884_s19, 0 }
  0x44   : > { %s170_s28 = sand.u32 (!%p2887_p11), 1, %s2546_s13   ;;  %p2888_p13 = scmp.ne.s32.totalorder (!%p2887_p11), %s2883_s18, 0 }
  0x45   : > { %168 = sbr.rel (%p2887_p11) target bundleno = 1486 (0x5ce), region = 32  ;;  %s1556_s21 = sshll.u32 (!%p2887_p11), %s170_s28, 7 }
  0x46   : > { %s171_s30 = scalar_lea.sflag (!%p2887_p11), [#allocation3], %s170_s28  ;;  %s2705_s4 = scalar_lea.vmem (!%p2887_p11), [#allocation2], %s1556_s21 }
  0x4c   : > { %2533 = dma.done.wait (%p2888_p13), %s171_s30, 2048  }
  0x4d   : > { %2535 = vsyncadd (%p2888_p13), %s171_s30, 4294965248  ;;  %p2889_p3 = scmp.ne.s32.totalorder %s2882_s17, 0 }
  0x4f   : > { %2537 = dma.done.wait (%p2889_p3), [#allocation5], 12288  }
  0x50   : > { %2539 = vsyncadd (%p2889_p3), [#allocation5], 4294955008  ;;  %v224_v0 = vld [vmem:[#allocation4] sm:$0xff]  ;;  %v225_v1 = vld [vmem:[#allocation4 + $0x8] sm:$0xff]  ;;  %s1558_s10 = sshll.u32 %s1547_s16, 4  ;;  %vm1453_vm1 = vcmask 15360  }
  0x51   : > { %v226_v2 = vld [vmem:[#allocation4 + $0x10] sm:$0xff]  ;;  %v2118_v3 = vpack.c.bf16 %v225_v1, %v224_v0  ;;  %v227_v4 = vld [vmem:[#allocation4 + $0x18] sm:$0xff]  ;;  %v228_v6 = vld [vmem:[#allocation4 + $0x20] sm:$0xff]  ;;  %p203_p7 = scmp.lt.s32.totalorder %s1558_s10, 31 }
  0x52   : > { %v2122_v5 = vpack.c.bf16 %v227_v4, %v226_v2  ;;  %v229_v7 = vld [vmem:[#allocation4 + $0x28] sm:$0xff]  ;;  %v208_v9 = vld [vmem:[%s2705_s4] sm:$0xff]  ;;  %v230_v10 = vld [vmem:[#allocation4 + $0x30] sm:$0xff] }
  0x53   : > { %2119 = vmatprep.subr.bf16.mxu0 %v2118_v3  ;;  %v2126_v8 = vpack.c.bf16 %v229_v7, %v228_v6  ;;  %v231_v11 = vld [vmem:[#allocation4 + $0x38] sm:$0xff]  ;;  %1814 = vmatprep.mubr.f32.mxu0 %v208_v9  ;;  %v232_v13 = vld [vmem:[#allocation4 + $0x40] sm:$0xff]  ;;  %v233_v14 = vld [vmem:[#allocation4 + $0x48] sm:$0xff]  ;;  %s2895_s10 = smov (!%p203_p7, %s1558_s10), 31 }
  0x54   : > { %2121 = vmatpush3.bf16.msra.mxu0 %v2118_v3  ;;  %v2130_v12 = vpack.c.bf16 %v231_v11, %v230_v10  ;;  %v409_v15 = vld [vmem:[#allocation4 + $0x80] sm:$0xff]  ;;  %v410_v16 = vld [vmem:[#allocation4 + $0x88] sm:$0xff]  ;;  %v411_v17 = vld [vmem:[#allocation4 + $0x90] sm:$0xff]  ;;  %v2134_v21 = vpack.c.bf16 %v233_v14, %v232_v13  ;;  %s1559_s15 = sshll.u32 %s2895_s10, 3 }
  0x55   : > { %2123 = vmatprep.subr.bf16.mxu0 %v2122_v5  ;;  %v412_v18 = vld [vmem:[#allocation4 + $0x98] sm:$0xff]  ;;  %v2150_v19 = vpack.c.bf16 %v410_v16, %v409_v15  ;;  %v413_v22 = vld [vmem:[#allocation4 + $0xa0] sm:$0xff]  ;;  %v414_v23 = vld [vmem:[#allocation4 + $0xa8] sm:$0xff]  ;;  %s2783_s20 = scalar_lea.vmem %s2877_s3, %s1559_s15 }
  0x56   : > { %v2154_v20 = vpack.c.bf16 %v412_v18, %v411_v17  ;;  %v234_v24 = vld [vmem:[#allocation4 + $0x50] sm:$0xff]  ;;  %v235_v25 = vld [vmem:[#allocation4 + $0x58] sm:$0xff]  ;;  %v2158_v26 = vpack.c.bf16 %v414_v23, %v413_v22  ;;  %v236_v30 = vld [vmem:[#allocation4 + $0x60] sm:$0xff] }
  0x57   : > { %2151 = vmatprep.subr.bf16.mxu1 %v2150_v19  ;;  %v2138_v27 = vpack.c.bf16 %v235_v25, %v234_v24  ;;  %v415_v28 = vld [vmem:[#allocation4 + $0xb0] sm:$0xff]  ;;  %v416_v29 = vld [vmem:[#allocation4 + $0xb8] sm:$0xff]  ;;  %v237_v31 = vld [vmem:[#allocation4 + $0x68] sm:$0xff] }
  0x58   : > { %2125 = vmatpush3.bf16.msra.mxu0 %v2122_v5  ;;  %2153 = vmatpush3.bf16.msra.mxu1 %v2150_v19  ;;  %v2162_v32 = vpack.c.bf16 %v416_v29, %v415_v28  ;;  %v2142_v33 = vpack.c.bf16 %v237_v31, %v236_v30  ;;  %v417_v34 = vld [vmem:[#allocation4 + $0xc0] sm:$0xff]  ;;  %v418_v35 = vld [vmem:[#allocation4 + $0xc8] sm:$0xff]  ;;  %v238_v36 = vld [vmem:[#allocation4 + $0x70] sm:$0xff] }
  0x59   : > { %2127 = vmatprep.subr.bf16.mxu0 %v2126_v8  ;;  %2155 = vmatprep.subr.bf16.mxu1 %v2154_v20  ;;  %v239_v37 = vld [vmem:[#allocation4 + $0x78] sm:$0xff]  ;;  %v2166_v38 = vpack.c.bf16 %v418_v35, %v417_v34  ;;  %v419_v40 = vld [vmem:[#allocation4 + $0xd0] sm:$0xff]  ;;  %v421_v43 = vld [vmem:[#allocation4 + $0xe0] sm:$0xff] }
  0x5a   : > { %v2146_v39 = vpack.c.bf16 %v239_v37, %v238_v36  ;;  %v420_v41 = vld [vmem:[#allocation4 + $0xd8] sm:$0xff]  ;;  %v422_v44 = vld [vmem:[#allocation4 + $0xe8] sm:$0xff]  ;;  %v210_v47 = vld [vmem:[%s2705_s4 + $0x10] sm:$0xff] }
  0x5b   : > { %v2170_v42 = vpack.c.bf16 %v420_v41, %v419_v40  ;;  %v209_v45 = vld [vmem:[%s2705_s4 + $0x8] sm:$0xff]  ;;  %v2174_v46 = vpack.c.bf16 %v422_v44, %v421_v43  ;;  %v211_v48 = vld [vmem:[%s2705_s4 + $0x18] sm:$0xff]  ;;  %v212_v49 = vld [vmem:[%s2705_s4 + $0x20] sm:$0xff] }
  0x5c   : > { %2129 = vmatpush3.bf16.msra.mxu0 %v2126_v8  ;;  %2157 = vmatpush3.bf16.msra.mxu1 %v2154_v20  ;;  %v213_v50 = vld [vmem:[%s2705_s4 + $0x28] sm:$0xff]  ;;  %v214_v51 = vld [vmem:[%s2705_s4 + $0x30] sm:$0xff]  ;;  %v215_v52 = vld [vmem:[%s2705_s4 + $0x38] sm:$0xff] }
  0x5d   : > { %2131 = vmatprep.subr.bf16.mxu0 %v2130_v12  ;;  %2159 = vmatprep.subr.bf16.mxu1 %v2158_v26  ;;  %v216_v53 = vld [vmem:[%s2705_s4 + $0x40] sm:$0xff]  ;;  %v217_v54 = vld [vmem:[%s2705_s4 + $0x48] sm:$0xff]  ;;  %v218_v55 = vld [vmem:[%s2705_s4 + $0x50] sm:$0xff] }
  0x5e   : > { %v219_v56 = vld [vmem:[%s2705_s4 + $0x58] sm:$0xff]  ;;  %v220_v57 = vld [vmem:[%s2705_s4 + $0x60] sm:$0xff]  ;;  %v221_v58 = vld [vmem:[%s2705_s4 + $0x68] sm:$0xff] }
  0x5f   : > { %v222_v59 = vld [vmem:[%s2705_s4 + $0x70] sm:$0xff]  ;;  %v223_v60 = vld [vmem:[%s2705_s4 + $0x78] sm:$0xff]  ;;  %v595_v0 = vld [vmem:[#allocation4 + $0x100] sm:$0xff] }
  0x60   : > { %2133 = vmatpush3.bf16.msra.mxu0 %v2130_v12  ;;  %2161 = vmatpush3.bf16.msra.mxu1 %v2158_v26  ;;  %v423_v61 = vld [vmem:[#allocation4 + $0xf0] sm:$0xff]  ;;  %v424_v62 = vld [vmem:[#allocation4 + $0xf8] sm:$0xff]  ;;  %v596_v1 = vld [vmem:[#allocation4 + $0x108] sm:$0xff] }
  0x61   : > { %2135 = vmatprep.subr.bf16.mxu0 %v2134_v21  ;;  %2163 = vmatprep.subr.bf16.mxu1 %v2162_v32  ;;  %v2178_v63 = vpack.c.bf16 %v424_v62, %v423_v61  ;;  %v597_v2 = vld [vmem:[#allocation4 + $0x110] sm:$0xff]  ;;  %v2182_v3 = vpack.c.bf16 %v596_v1, %v595_v0  ;;  %v598_v4 = vld [vmem:[#allocation4 + $0x118] sm:$0xff]  ;;  %v599_v6 = vld [vmem:[#allocation4 + $0x120] sm:$0xff] }
  0x62   : > { %v2186_v5 = vpack.c.bf16 %v598_v4, %v597_v2  ;;  %v600_v7 = vld [vmem:[#allocation4 + $0x128] sm:$0xff]  ;;  %v601_v9 = vld [vmem:[#allocation4 + $0x130] sm:$0xff]  ;;  %v602_v10 = vld [vmem:[#allocation4 + $0x138] sm:$0xff] }
  0x63   : > { %v2190_v8 = vpack.c.bf16 %v600_v7, %v599_v6  ;;  %v2194_v11 = vpack.c.bf16 %v602_v10, %v601_v9  ;;  %v603_v12 = vld [vmem:[#allocation4 + $0x140] sm:$0xff]  ;;  %v604_v13 = vld [vmem:[#allocation4 + $0x148] sm:$0xff]  ;;  %v605_v15 = vld [vmem:[#allocation4 + $0x150] sm:$0xff] }
  0x64   : > { %2137 = vmatpush3.bf16.msra.mxu0 %v2134_v21  ;;  %2165 = vmatpush3.bf16.msra.mxu1 %v2162_v32  ;;  %v2198_v14 = vpack.c.bf16 %v604_v13, %v603_v12  ;;  %v606_v16 = vld [vmem:[#allocation4 + $0x158] sm:$0xff]  ;;  %v607_v18 = vld [vmem:[#allocation4 + $0x160] sm:$0xff]  ;;  %v608_v19 = vld [vmem:[#allocation4 + $0x168] sm:$0xff] }
  0x65   : > { %2139 = vmatprep.subr.bf16.mxu0 %v2138_v27  ;;  %2167 = vmatprep.subr.bf16.mxu1 %v2166_v38  ;;  %v2202_v17 = vpack.c.bf16 %v606_v16, %v605_v15  ;;  %v2206_v20 = vpack.c.bf16 %v608_v19, %v607_v18  ;;  %v1560_v21 = vld [vmem:[%s2876_s2] ss:$0 sm:$0xff]  ;;  %v609_v6 = vld [vmem:[#allocation4 + $0x170] sm:$0xff]  ;;  %v610_v7 = vld [vmem:[#allocation4 + $0x178] sm:$0xff] }
  0x66   : > { %v781_v9 = vld [vmem:[#allocation4 + $0x180] sm:$0xff]  ;;  %v782_v10 = vld [vmem:[#allocation4 + $0x188] sm:$0xff]  ;;  %v784_v13 = vld [vmem:[#allocation4 + $0x198] sm:$0xff] }
  0x67   : > { %v2214_v12 = vpack.c.bf16 %v782_v10, %v781_v9  ;;  %v785_v15 = vld [vmem:[#allocation4 + $0x1a0] sm:$0xff]  ;;  %v786_v16 = vld [vmem:[#allocation4 + $0x1a8] sm:$0xff]  ;;  %v787_v18 = vld [vmem:[#allocation4 + $0x1b0] sm:$0xff] }
  0x68   : > { %2141 = vmatpush3.bf16.msra.mxu0 %v2138_v27  ;;  %2169 = vmatpush3.bf16.msra.mxu1 %v2166_v38  ;;  %v788_v19 = vld [vmem:[#allocation4 + $0x1b8] sm:$0xff] }
  0x69   : > { %2143 = vmatprep.subr.bf16.mxu0 %v2142_v33  ;;  %2171 = vmatprep.subr.bf16.mxu1 %v2170_v42 }
  0x6c   : > { %2145 = vmatpush3.bf16.msra.mxu0 %v2142_v33  ;;  %2173 = vmatpush3.bf16.msra.mxu1 %v2170_v42 }
  0x6d   : > { %2147 = vmatprep.subr.bf16.mxu0 %v2146_v39  ;;  %2175 = vmatprep.subr.bf16.mxu1 %v2174_v46 }
  0x70   : > { %2149 = vmatpush3.bf16.msra.mxu0 %v2146_v39  ;;  %2177 = vmatpush3.bf16.msra.mxu1 %v2174_v46 }
  0x71   : > { %2179 = vmatprep.subr.bf16.mxu1 %v2178_v63  ;;  %2183 = vmatprep.subr.bf16.mxu0 %v2182_v3 }
  0x73   : > { %1815 = vmatmul.mubr.f32.vlgmr.msra.gmra.mrb[0].mxu0 %v209_v45 }
  0x74   : > { %1817 = vmatprep.mubr.f32.mxu0 %v210_v47  ;;  %2181 = vmatpush3.bf16.msra.mxu1 %v2178_v63 }
  0x75   : > { %2185 = vmatpush3.bf16.msra.mxu0 %v2182_v3  ;;  %2215 = vmatprep.subr.bf16.mxu1 %v2214_v12 }
  0x76   : > { %2187 = vmatprep.subr.bf16.mxu0 %v2186_v5 }
  0x77   : > { %1818 = vmatmul.mubr.f32.gmra.mrb[2].mxu0 %v211_v48 }
  0x78   : > { %1820 = vmatprep.mubr.f32.mxu0 %v212_v49 }
  0x79   : > { %2189 = vmatpush3.bf16.msra.mxu0 %v2186_v5 }
  0x7a   : > { %2191 = vmatprep.subr.bf16.mxu0 %v2190_v8 }
  0x7b   : > { %1821 = vmatmul.mubr.f32.gmra.mrb[4].mxu0 %v213_v50 }
  0x7c   : > { %1823 = vmatprep.mubr.f32.mxu0 %v214_v51 }
  0x7d   : > { %2193 = vmatpush3.bf16.msra.mxu0 %v2190_v8  ;;  %v2210_v8 = vpack.c.bf16 %v610_v7, %v609_v6 }
  0x7e   : > { %2195 = vmatprep.subr.bf16.mxu0 %v2194_v11 }
  0x7f   : > { %1824 = vmatmul.mubr.f32.gmra.mrb[6].mxu0 %v215_v52 }
  0x80   : > { %1826 = vmatprep.mubr.f32.mxu0 %v216_v53 }
  0x81   : > { %2197 = vmatpush3.bf16.msra.mxu0 %v2194_v11  ;;  %v783_v11 = vld [vmem:[#allocation4 + $0x190] sm:$0xff] }
  0x82   : > { %2199 = vmatprep.subr.bf16.mxu0 %v2198_v14 }
  0x83   : > { %1827 = vmatmul.mubr.f32.gmra.mrb[8].mxu0 %v217_v54 }
  0x84   : > { %1829 = vmatprep.mubr.f32.mxu0 %v218_v55 }
  0x85   : > { %2201 = vmatpush3.bf16.msra.mxu0 %v2198_v14  ;;  %v2218_v14 = vpack.c.bf16 %v784_v13, %v783_v11 }
  0x86   : > { %2203 = vmatprep.subr.bf16.mxu0 %v2202_v17 }
  0x87   : > { %1830 = vmatmul.mubr.f32.gmra.mrb[10].mxu0 %v219_v56 }
  0x88   : > { %1832 = vmatprep.mubr.f32.mxu0 %v220_v57 }
  0x89   : > { %2205 = vmatpush3.bf16.msra.mxu0 %v2202_v17  ;;  %v2222_v17 = vpack.c.bf16 %v786_v16, %v785_v15  ;;  %v795_v15 = vld [vmem:[#allocation4 + $0x1f0] sm:$0xff]  ;;  %v796_v16 = vld [vmem:[#allocation4 + $0x1f8] sm:$0xff] }
  0x8a   : > { %2207 = vmatprep.subr.bf16.mxu0 %v2206_v20 }
  0x8b   : > { %1833 = vmatmul.mubr.f32.gmra.mrb[12].mxu0 %v221_v58 }
  0x8c   : > { %1835 = vmatprep.mubr.f32.mxu0 %v222_v59 }
  0x8d   : > { %2209 = vmatpush3.bf16.msra.mxu0 %v2206_v20  ;;  %v2226_v20 = vpack.c.bf16 %v788_v19, %v787_v18  ;;  %v967_v18 = vld [vmem:[#allocation4 + $0x200] sm:$0xff]  ;;  %v968_v19 = vld [vmem:[#allocation4 + $0x208] sm:$0xff] }
  0x8e   : > { %2211 = vmatprep.subr.bf16.mxu0 %v2210_v8 }
  0x8f   : > { %1836 = vmatmul.mubr.f32.gmra.mrb[14].mxu0 %v223_v60 }
  0x91   : > { %2213 = vmatpush3.bf16.msra.mxu0 %v2210_v8 }
 0x146   : > { %v1816_v22 = vpop.f32.mrb[0].mxu0 }
 0x147   : > { %v319_v23 = vadd.f32 %v1816_v22, %v1560_v21  ;;  %v313_v24 = vpop.f32.mrb[1].mxu0  ;;  %v790_v22 = vld [vmem:[#allocation4 + $0x1c8] sm:$0xff] }
 0x148   : > { %v314_v25 = vadd.f32 %v1560_v21, %v313_v24  ;;  %v791_v24 = vld [vmem:[#allocation4 + $0x1d0] sm:$0xff] }
 0x149   : > { %v393_v28 = vmax.f32 %v319_v23, 0.0 }
 0x14a   : > { %v1819_v26 = vpop.f32.mrb[2].mxu0  ;;  %v392_v27 = vmax.f32 %v314_v25, 0.0  ;;  %v792_v25 = vld [vmem:[#allocation4 + $0x1d8] sm:$0xff] }
 0x14b   : > { %v329_v29 = vadd.f32 %v1819_v26, %v1560_v21  ;;  %v323_v30 = vpop.f32.mrb[3].mxu0  ;;  %v2234_v26 = vpack.c.bf16 %v792_v25, %v791_v24  ;;  %v971_v24 = vld [vmem:[#allocation4 + $0x220] sm:$0xff]  ;;  %v972_v25 = vld [vmem:[#allocation4 + $0x228] sm:$0xff] }
 0x14c   : > { %v324_v31 = vadd.f32 %v1560_v21, %v323_v30  ;;  %1870 = vmatprep.mubr.f32.mxu1 %v392_v27  ;;  %v793_v27 = vld [vmem:[#allocation4 + $0x1e0] sm:$0xff] }
 0x14d   : > { %1871 = vmatmul.mubr.f32.vlgmr.msra.gmra.mrb[0].mxu1 %v393_v28  ;;  %v395_v34 = vmax.f32 %v329_v29, 0.0  ;;  %v794_v28 = vld [vmem:[#allocation4 + $0x1e8] sm:$0xff]  ;;  %v1562_v30 = vld [vmem:[%s2876_s2 + $0x1] ss:$0 sm:$0xff] }
 0x14e   : > { %v394_v32 = vmax.f32 %v324_v31, 0.0  ;;  %v1822_v33 = vpop.f32.mrb[4].mxu0  ;;  %2217 = vmatpush3.bf16.msra.mxu1 %v2214_v12  ;;  %v2238_v29 = vpack.c.bf16 %v794_v28, %v793_v27  ;;  %v973_v27 = vld [vmem:[#allocation4 + $0x230] sm:$0xff]  ;;  %v974_v28 = vld [vmem:[#allocation4 + $0x238] sm:$0xff] }
 0x14f   : > { %v339_v35 = vadd.f32 %v1822_v33, %v1560_v21  ;;  %v333_v36 = vpop.f32.mrb[5].mxu0  ;;  %2219 = vmatprep.subr.bf16.mxu1 %v2218_v14 }
 0x150   : > { %v334_v37 = vadd.f32 %v1560_v21, %v333_v36  ;;  %1873 = vmatprep.mubr.f32.mxu1 %v394_v32 }
 0x151   : > { %1874 = vmatmul.mubr.f32.gmra.mrb[2].mxu1 %v395_v34  ;;  %v397_v40 = vmax.f32 %v339_v35, 0.0 }
 0x152   : > { %v396_v38 = vmax.f32 %v334_v37, 0.0  ;;  %v1825_v39 = vpop.f32.mrb[6].mxu0  ;;  %2221 = vmatpush3.bf16.msra.mxu1 %v2218_v14 }
 0x153   : > { %v349_v41 = vadd.f32 %v1825_v39, %v1560_v21  ;;  %v343_v42 = vpop.f32.mrb[7].mxu0  ;;  %2223 = vmatprep.subr.bf16.mxu1 %v2222_v17 }
 0x154   : > { %v344_v43 = vadd.f32 %v1560_v21, %v343_v42  ;;  %1876 = vmatprep.mubr.f32.mxu1 %v396_v38 }
 0x155   : > { %1877 = vmatmul.mubr.f32.gmra.mrb[4].mxu1 %v397_v40  ;;  %v399_v46 = vmax.f32 %v349_v41, 0.0 }
 0x156   : > { %v398_v44 = vmax.f32 %v344_v43, 0.0  ;;  %v1828_v45 = vpop.f32.mrb[8].mxu0  ;;  %2225 = vmatpush3.bf16.msra.mxu1 %v2222_v17  ;;  %v2242_v17 = vpack.c.bf16 %v796_v16, %v795_v15 }
 0x157   : > { %v359_v47 = vadd.f32 %v1828_v45, %v1560_v21  ;;  %v353_v48 = vpop.f32.mrb[9].mxu0  ;;  %2227 = vmatprep.subr.bf16.mxu1 %v2226_v20 }
 0x158   : > { %v354_v49 = vadd.f32 %v1560_v21, %v353_v48  ;;  %1879 = vmatprep.mubr.f32.mxu1 %v398_v44 }
 0x159   : > { %1880 = vmatmul.mubr.f32.gmra.mrb[6].mxu1 %v399_v46  ;;  %v401_v52 = vmax.f32 %v359_v47, 0.0 }
 0x15a   : > { %v400_v50 = vmax.f32 %v354_v49, 0.0  ;;  %v1831_v51 = vpop.f32.mrb[10].mxu0  ;;  %2229 = vmatpush3.bf16.msra.mxu1 %v2226_v20  ;;  %v969_v20 = vld [vmem:[#allocation4 + $0x210] sm:$0xff] }
 0x15b   : > { %v369_v53 = vadd.f32 %v1831_v51, %v1560_v21  ;;  %v363_v54 = vpop.f32.mrb[11].mxu0 }
 0x15c   : > { %v364_v55 = vadd.f32 %v1560_v21, %v363_v54  ;;  %1882 = vmatprep.mubr.f32.mxu1 %v400_v50 }
 0x15d   : > { %1883 = vmatmul.mubr.f32.gmra.mrb[8].mxu1 %v401_v52  ;;  %v403_v58 = vmax.f32 %v369_v53, 0.0 }
 0x15e   : > { %v402_v56 = vmax.f32 %v364_v55, 0.0  ;;  %v1834_v57 = vpop.f32.mrb[12].mxu0 }
 0x15f   : > { %v379_v59 = vadd.f32 %v1834_v57, %v1560_v21  ;;  %v373_v60 = vpop.f32.mrb[13].mxu0 }
 0x160   : > { %v374_v61 = vadd.f32 %v1560_v21, %v373_v60  ;;  %1885 = vmatprep.mubr.f32.mxu1 %v402_v56 }
 0x161   : > { %1886 = vmatmul.mubr.f32.gmra.mrb[10].mxu1 %v403_v58  ;;  %v405_v0 = vmax.f32 %v379_v59, 0.0 }
 0x162   : > { %v404_v62 = vmax.f32 %v374_v61, 0.0  ;;  %v1837_v63 = vpop.f32.mrb[14].mxu0 }
 0x163   : > { %v389_v1 = vadd.f32 %v1837_v63, %v1560_v21  ;;  %v383_v2 = vpop.f32.mrb[15].mxu0 }
 0x164   : > { %v384_v3 = vadd.f32 %v1560_v21, %v383_v2  ;;  %1888 = vmatprep.mubr.f32.mxu1 %v404_v62  ;;  %v789_v21 = vld [vmem:[#allocation4 + $0x1c0] sm:$0xff] }
 0x165   : > { %1889 = vmatmul.mubr.f32.gmra.mrb[12].mxu1 %v405_v0  ;;  %v407_v5 = vmax.f32 %v389_v1, 0.0  ;;  %v2230_v23 = vpack.c.bf16 %v790_v22, %v789_v21  ;;  %v2246_v21 = vpack.c.bf16 %v968_v19, %v967_v18  ;;  %v970_v22 = vld [vmem:[#allocation4 + $0x218] sm:$0xff] }
 0x166   : > { %v406_v4 = vmax.f32 %v384_v3, 0.0 }
 0x167   : > { %2231 = vmatprep.subr.bf16.mxu1 %v2230_v23  ;;  %2247 = vmatprep.subr.bf16.mxu0 %v2246_v21 }
 0x168   : > { %1891 = vmatprep.mubr.f32.mxu1 %v406_v4  ;;  %2233 = vmatpush3.bf16.msra.mxu1 %v2230_v23  ;;  %v2250_v23 = vpack.c.bf16 %v970_v22, %v969_v20 }
 0x169   : > { %1892 = vmatmul.mubr.f32.gmra.mrb[14].mxu1 %v407_v5  ;;  %2235 = vmatprep.subr.bf16.mxu1 %v2234_v26 }
 0x16c   : > { %2237 = vmatpush3.bf16.msra.mxu1 %v2234_v26  ;;  %v2254_v26 = vpack.c.bf16 %v972_v25, %v971_v24  ;;  %v981_v24 = vld [vmem:[#allocation4 + $0x270] sm:$0xff]  ;;  %v982_v25 = vld [vmem:[#allocation4 + $0x278] sm:$0xff] }
 0x16d   : > { %2239 = vmatprep.subr.bf16.mxu1 %v2238_v29 }
 0x170   : > { %2241 = vmatpush3.bf16.msra.mxu1 %v2238_v29  ;;  %v2258_v29 = vpack.c.bf16 %v974_v28, %v973_v27  ;;  %v1153_v27 = vld [vmem:[#allocation4 + $0x280] sm:$0xff]  ;;  %v1154_v28 = vld [vmem:[#allocation4 + $0x288] sm:$0xff] }
 0x171   : > { %2243 = vmatprep.subr.bf16.mxu1 %v2242_v17 }
 0x174   : > { %2245 = vmatpush3.bf16.msra.mxu1 %v2242_v17 }
 0x220   : > { %v1872_v31 = vpop.f32.mrb[0].mxu1 }
 0x221   : > { %v505_v32 = vadd.f32 %v1872_v31, %v1562_v30  ;;  %v499_v33 = vpop.f32.mrb[1].mxu1  ;;  %v976_v31 = vld [vmem:[#allocation4 + $0x248] sm:$0xff] }
 0x222   : > { %v500_v34 = vadd.f32 %v1562_v30, %v499_v33  ;;  %v977_v33 = vld [vmem:[#allocation4 + $0x250] sm:$0xff] }
 0x223   : > { %v579_v37 = vmax.f32 %v505_v32, 0.0 }
 0x224   : > { %v578_v35 = vmax.f32 %v500_v34, 0.0  ;;  %v1875_v36 = vpop.f32.mrb[2].mxu1  ;;  %v978_v34 = vld [vmem:[#allocation4 + $0x258] sm:$0xff] }
 0x225   : > { %v515_v38 = vadd.f32 %v1875_v36, %v1562_v30  ;;  %v509_v39 = vpop.f32.mrb[3].mxu1  ;;  %v979_v36 = vld [vmem:[#allocation4 + $0x260] sm:$0xff] }
 0x226   : > { %v510_v40 = vadd.f32 %v1562_v30, %v509_v39  ;;  %1926 = vmatprep.mubr.f32.mxu0 %v578_v35  ;;  %v2266_v35 = vpack.c.bf16 %v978_v34, %v977_v33  ;;  %v1564_v39 = vld [vmem:[%s2876_s2 + $0x2] ss:$0 sm:$0xff]  ;;  %v1158_v34 = vld [vmem:[#allocation4 + $0x2a8] sm:$0xff] }
 0x227   : > { %1927 = vmatmul.mubr.f32.vlgmr.msra.gmra.mrb[16].mxu0 %v579_v37  ;;  %v581_v43 = vmax.f32 %v515_v38, 0.0  ;;  %v980_v37 = vld [vmem:[#allocation4 + $0x268] sm:$0xff]  ;;  %v1157_v33 = vld [vmem:[#allocation4 + $0x2a0] sm:$0xff] }
 0x228   : > { %v580_v41 = vmax.f32 %v510_v40, 0.0  ;;  %v1878_v42 = vpop.f32.mrb[4].mxu1  ;;  %2249 = vmatpush3.bf16.msra.mxu0 %v2246_v21  ;;  %v2270_v38 = vpack.c.bf16 %v980_v37, %v979_v36  ;;  %v1159_v36 = vld [vmem:[#allocation4 + $0x2b0] sm:$0xff]  ;;  %v1160_v37 = vld [vmem:[#allocation4 + $0x2b8] sm:$0xff] }
 0x229   : > { %v525_v44 = vadd.f32 %v1878_v42, %v1562_v30  ;;  %v519_v45 = vpop.f32.mrb[5].mxu1  ;;  %2251 = vmatprep.subr.bf16.mxu0 %v2250_v23 }
 0x22a   : > { %v520_v46 = vadd.f32 %v1562_v30, %v519_v45  ;;  %1929 = vmatprep.mubr.f32.mxu0 %v580_v41 }
 0x22b   : > { %1930 = vmatmul.mubr.f32.gmra.mrb[18].mxu0 %v581_v43  ;;  %v583_v49 = vmax.f32 %v525_v44, 0.0 }
 0x22c   : > { %v582_v47 = vmax.f32 %v520_v46, 0.0  ;;  %v1881_v48 = vpop.f32.mrb[6].mxu1  ;;  %2253 = vmatpush3.bf16.msra.mxu0 %v2250_v23 }
 0x22d   : > { %v535_v50 = vadd.f32 %v1881_v48, %v1562_v30  ;;  %v529_v51 = vpop.f32.mrb[7].mxu1  ;;  %2255 = vmatprep.subr.bf16.mxu0 %v2254_v26 }
 0x22e   : > { %v530_v52 = vadd.f32 %v1562_v30, %v529_v51  ;;  %1932 = vmatprep.mubr.f32.mxu0 %v582_v47 }
 0x22f   : > { %1933 = vmatmul.mubr.f32.gmra.mrb[20].mxu0 %v583_v49  ;;  %v585_v55 = vmax.f32 %v535_v50, 0.0 }
 0x230   : > { %v584_v53 = vmax.f32 %v530_v52, 0.0  ;;  %v1884_v54 = vpop.f32.mrb[8].mxu1  ;;  %2257 = vmatpush3.bf16.msra.mxu0 %v2254_v26  ;;  %v2274_v26 = vpack.c.bf16 %v982_v25, %v981_v24 }
 0x231   : > { %v545_v56 = vadd.f32 %v1884_v54, %v1562_v30  ;;  %v539_v57 = vpop.f32.mrb[9].mxu1  ;;  %2259 = vmatprep.subr.bf16.mxu0 %v2258_v29 }
 0x232   : > { %v540_v58 = vadd.f32 %v1562_v30, %v539_v57  ;;  %1935 = vmatprep.mubr.f32.mxu0 %v584_v53 }
 0x233   : > { %1936 = vmatmul.mubr.f32.gmra.mrb[22].mxu0 %v585_v55  ;;  %v587_v61 = vmax.f32 %v545_v56, 0.0 }
 0x234   : > { %v586_v59 = vmax.f32 %v540_v58, 0.0  ;;  %v1887_v60 = vpop.f32.mrb[10].mxu1  ;;  %2261 = vmatpush3.bf16.msra.mxu0 %v2258_v29  ;;  %v1155_v29 = vld [vmem:[#allocation4 + $0x290] sm:$0xff] }
 0x235   : > { %v555_v62 = vadd.f32 %v1887_v60, %v1562_v30  ;;  %v549_v63 = vpop.f32.mrb[11].mxu1 }
 0x236   : > { %v550_v0 = vadd.f32 %v1562_v30, %v549_v63  ;;  %1938 = vmatprep.mubr.f32.mxu0 %v586_v59 }
 0x237   : > { %1939 = vmatmul.mubr.f32.gmra.mrb[24].mxu0 %v587_v61  ;;  %v589_v3 = vmax.f32 %v555_v62, 0.0 }
 0x238   : > { %v588_v1 = vmax.f32 %v550_v0, 0.0  ;;  %v1890_v2 = vpop.f32.mrb[12].mxu1 }
 0x239   : > { %v565_v4 = vadd.f32 %v1890_v2, %v1562_v30  ;;  %v559_v5 = vpop.f32.mrb[13].mxu1 }
 0x23a   : > { %v560_v6 = vadd.f32 %v1562_v30, %v559_v5  ;;  %1941 = vmatprep.mubr.f32.mxu0 %v588_v1 }
 0x23b   : > { %1942 = vmatmul.mubr.f32.gmra.mrb[26].mxu0 %v589_v3  ;;  %v591_v9 = vmax.f32 %v565_v4, 0.0 }
 0x23c   : > { %v590_v7 = vmax.f32 %v560_v6, 0.0  ;;  %v1893_v8 = vpop.f32.mrb[14].mxu1 }
 0x23d   : > { %v575_v10 = vadd.f32 %v1893_v8, %v1562_v30  ;;  %v569_v11 = vpop.f32.mrb[15].mxu1 }
 0x23e   : > { %v570_v12 = vadd.f32 %v1562_v30, %v569_v11  ;;  %1944 = vmatprep.mubr.f32.mxu0 %v590_v7  ;;  %v975_v30 = vld [vmem:[#allocation4 + $0x240] sm:$0xff] }
 0x23f   : > { %1945 = vmatmul.mubr.f32.gmra.mrb[28].mxu0 %v591_v9  ;;  %v593_v14 = vmax.f32 %v575_v10, 0.0  ;;  %v2262_v32 = vpack.c.bf16 %v976_v31, %v975_v30  ;;  %v2278_v30 = vpack.c.bf16 %v1154_v28, %v1153_v27  ;;  %v1156_v31 = vld [vmem:[#allocation4 + $0x298] sm:$0xff] }
 0x240   : > { %v592_v13 = vmax.f32 %v570_v12, 0.0 }
 0x241   : > { %2263 = vmatprep.subr.bf16.mxu0 %v2262_v32  ;;  %2279 = vmatprep.subr.bf16.mxu1 %v2278_v30 }
 0x242   : > { %1947 = vmatprep.mubr.f32.mxu0 %v592_v13  ;;  %2265 = vmatpush3.bf16.msra.mxu0 %v2262_v32  ;;  %v2282_v32 = vpack.c.bf16 %v1156_v31, %v1155_v29 }
 0x243   : > { %1948 = vmatmul.mubr.f32.gmra.mrb[30].mxu0 %v593_v14  ;;  %2267 = vmatprep.subr.bf16.mxu0 %v2266_v35 }
 0x246   : > { %2269 = vmatpush3.bf16.msra.mxu0 %v2266_v35  ;;  %v2286_v35 = vpack.c.bf16 %v1158_v34, %v1157_v33  ;;  %v1167_v33 = vld [vmem:[#allocation4 + $0x2f0] sm:$0xff]  ;;  %v1168_v34 = vld [vmem:[#allocation4 + $0x2f8] sm:$0xff] }
 0x247   : > { %2271 = vmatprep.subr.bf16.mxu0 %v2270_v38 }
 0x24a   : > { %2273 = vmatpush3.bf16.msra.mxu0 %v2270_v38  ;;  %v2290_v38 = vpack.c.bf16 %v1160_v37, %v1159_v36  ;;  %v1568_v36 = vld [vmem:[%s2876_s2 + $0x4] ss:$0 sm:$0xff] }
 0x24b   : > { %2275 = vmatprep.subr.bf16.mxu0 %v2274_v26 }
 0x24e   : > { %2277 = vmatpush3.bf16.msra.mxu0 %v2274_v26 }
 0x2fa   : > { %v1928_v40 = vpop.f32.mrb[16].mxu0 }
 0x2fb   : > { %v691_v41 = vadd.f32 %v1928_v40, %v1564_v39  ;;  %v685_v42 = vpop.f32.mrb[17].mxu0  ;;  %v1162_v40 = vld [vmem:[#allocation4 + $0x2c8] sm:$0xff] }
 0x2fc   : > { %v686_v43 = vadd.f32 %v1564_v39, %v685_v42  ;;  %v1163_v42 = vld [vmem:[#allocation4 + $0x2d0] sm:$0xff] }
 0x2fd   : > { %v765_v46 = vmax.f32 %v691_v41, 0.0 }
 0x2fe   : > { %v764_v44 = vmax.f32 %v686_v43, 0.0  ;;  %v1931_v45 = vpop.f32.mrb[18].mxu0  ;;  %v1164_v43 = vld [vmem:[#allocation4 + $0x2d8] sm:$0xff] }
 0x2ff   : > { %v701_v47 = vadd.f32 %v1931_v45, %v1564_v39  ;;  %v695_v48 = vpop.f32.mrb[19].mxu0  ;;  %v1165_v45 = vld [vmem:[#allocation4 + $0x2e0] sm:$0xff] }
 0x300   : > { %v696_v49 = vadd.f32 %v1564_v39, %v695_v48  ;;  %1982 = vmatprep.mubr.f32.mxu1 %v764_v44  ;;  %v2298_v44 = vpack.c.bf16 %v1164_v43, %v1163_v42  ;;  %v1566_v48 = vld [vmem:[%s2876_s2 + $0x3] ss:$0 sm:$0xff] }
 0x301   : > { %1983 = vmatmul.mubr.f32.vlgmr.msra.gmra.mrb[16].mxu1 %v765_v46  ;;  %v767_v52 = vmax.f32 %v701_v47, 0.0  ;;  %v1166_v46 = vld [vmem:[#allocation4 + $0x2e8] sm:$0xff] }
 0x302   : > { %v766_v50 = vmax.f32 %v696_v49, 0.0  ;;  %v1934_v51 = vpop.f32.mrb[20].mxu0  ;;  %2281 = vmatpush3.bf16.msra.mxu1 %v2278_v30  ;;  %v2302_v47 = vpack.c.bf16 %v1166_v46, %v1165_v45 }
 0x303   : > { %v711_v53 = vadd.f32 %v1934_v51, %v1564_v39  ;;  %v705_v54 = vpop.f32.mrb[21].mxu0  ;;  %2283 = vmatprep.subr.bf16.mxu1 %v2282_v32 }
 0x304   : > { %v706_v55 = vadd.f32 %v1564_v39, %v705_v54  ;;  %1985 = vmatprep.mubr.f32.mxu1 %v766_v50 }
 0x305   : > { %1986 = vmatmul.mubr.f32.gmra.mrb[18].mxu1 %v767_v52  ;;  %v769_v58 = vmax.f32 %v711_v53, 0.0 }
 0x306   : > { %v768_v56 = vmax.f32 %v706_v55, 0.0  ;;  %v1937_v57 = vpop.f32.mrb[22].mxu0  ;;  %2285 = vmatpush3.bf16.msra.mxu1 %v2282_v32 }
 0x307   : > { %v721_v59 = vadd.f32 %v1937_v57, %v1564_v39  ;;  %v715_v60 = vpop.f32.mrb[23].mxu0  ;;  %2287 = vmatprep.subr.bf16.mxu1 %v2286_v35 }
 0x308   : > { %v716_v61 = vadd.f32 %v1564_v39, %v715_v60  ;;  %1988 = vmatprep.mubr.f32.mxu1 %v768_v56 }
 0x309   : > { %1989 = vmatmul.mubr.f32.gmra.mrb[20].mxu1 %v769_v58  ;;  %v771_v0 = vmax.f32 %v721_v59, 0.0 }
 0x30a   : > { %v770_v62 = vmax.f32 %v716_v61, 0.0  ;;  %v1940_v63 = vpop.f32.mrb[24].mxu0  ;;  %2289 = vmatpush3.bf16.msra.mxu1 %v2286_v35  ;;  %v2306_v35 = vpack.c.bf16 %v1168_v34, %v1167_v33 }
 0x30b   : > { %v731_v1 = vadd.f32 %v1940_v63, %v1564_v39  ;;  %v725_v2 = vpop.f32.mrb[25].mxu0  ;;  %2291 = vmatprep.subr.bf16.mxu1 %v2290_v38 }
 0x30c   : > { %v726_v3 = vadd.f32 %v1564_v39, %v725_v2  ;;  %1991 = vmatprep.mubr.f32.mxu1 %v770_v62 }
 0x30d   : > { %1992 = vmatmul.mubr.f32.gmra.mrb[22].mxu1 %v771_v0  ;;  %v773_v6 = vmax.f32 %v731_v1, 0.0 }
 0x30e   : > { %v772_v4 = vmax.f32 %v726_v3, 0.0  ;;  %v1943_v5 = vpop.f32.mrb[26].mxu0  ;;  %2293 = vmatpush3.bf16.msra.mxu1 %v2290_v38 }
 0x30f   : > { %v741_v7 = vadd.f32 %v1943_v5, %v1564_v39  ;;  %v735_v8 = vpop.f32.mrb[27].mxu0 }
 0x310   : > { %v736_v9 = vadd.f32 %v1564_v39, %v735_v8  ;;  %1994 = vmatprep.mubr.f32.mxu1 %v772_v4 }
 0x311   : > { %1995 = vmatmul.mubr.f32.gmra.mrb[24].mxu1 %v773_v6  ;;  %v775_v12 = vmax.f32 %v741_v7, 0.0 }
 0x312   : > { %v774_v10 = vmax.f32 %v736_v9, 0.0  ;;  %v1946_v11 = vpop.f32.mrb[28].mxu0 }
 0x313   : > { %v751_v13 = vadd.f32 %v1946_v11, %v1564_v39  ;;  %v745_v14 = vpop.f32.mrb[29].mxu0 }
 0x314   : > { %v746_v15 = vadd.f32 %v1564_v39, %v745_v14  ;;  %1997 = vmatprep.mubr.f32.mxu1 %v774_v10 }
 0x315   : > { %1998 = vmatmul.mubr.f32.gmra.mrb[26].mxu1 %v775_v12  ;;  %v777_v18 = vmax.f32 %v751_v13, 0.0 }
 0x316   : > { %v776_v16 = vmax.f32 %v746_v15, 0.0  ;;  %v1949_v17 = vpop.f32.mrb[30].mxu0 }
 0x317   : > { %v761_v19 = vadd.f32 %v1949_v17, %v1564_v39  ;;  %v755_v20 = vpop.f32.mrb[31].mxu0 }
 0x318   : > { %v756_v21 = vadd.f32 %v1564_v39, %v755_v20  ;;  %2000 = vmatprep.mubr.f32.mxu1 %v776_v16  ;;  %v1161_v39 = vld [vmem:[#allocation4 + $0x2c0] sm:$0xff] }
 0x319   : > { %2001 = vmatmul.mubr.f32.gmra.mrb[28].mxu1 %v777_v18  ;;  %v779_v23 = vmax.f32 %v761_v19, 0.0  ;;  %v2294_v41 = vpack.c.bf16 %v1162_v40, %v1161_v39 }
 0x31a   : > { %v778_v22 = vmax.f32 %v756_v21, 0.0 }
 0x31b   : > { %2295 = vmatprep.subr.bf16.mxu1 %v2294_v41 }
 0x31c   : > { %2003 = vmatprep.mubr.f32.mxu1 %v778_v22  ;;  %2297 = vmatpush3.bf16.msra.mxu1 %v2294_v41 }
 0x31d   : > { %2004 = vmatmul.mubr.f32.gmra.mrb[30].mxu1 %v779_v23  ;;  %2299 = vmatprep.subr.bf16.mxu1 %v2298_v44 }
 0x320   : > { %2301 = vmatpush3.bf16.msra.mxu1 %v2298_v44 }
 0x321   : > { %2303 = vmatprep.subr.bf16.mxu1 %v2302_v47 }
 0x324   : > { %2305 = vmatpush3.bf16.msra.mxu1 %v2302_v47 }
 0x325   : > { %2307 = vmatprep.subr.bf16.mxu1 %v2306_v35 }
 0x328   : > { %2309 = vmatpush3.bf16.msra.mxu1 %v2306_v35 }
 0x3d4   : > { %v1984_v49 = vpop.f32.mrb[16].mxu1 }
 0x3d5   : > { %v877_v50 = vadd.f32 %v1984_v49, %v1566_v48  ;;  %v871_v51 = vpop.f32.mrb[17].mxu1 }
 0x3d6   : > { %v872_v52 = vadd.f32 %v1566_v48, %v871_v51 }
 0x3d7   : > { %v951_v55 = vmax.f32 %v877_v50, 0.0 }
 0x3d8   : > { %v950_v53 = vmax.f32 %v872_v52, 0.0  ;;  %v1987_v54 = vpop.f32.mrb[18].mxu1 }
 0x3d9   : > { %v887_v56 = vadd.f32 %v1987_v54, %v1566_v48  ;;  %v881_v57 = vpop.f32.mrb[19].mxu1 }
 0x3da   : > { %v882_v58 = vadd.f32 %v1566_v48, %v881_v57  ;;  %2038 = vmatprep.mubr.f32.mxu0 %v950_v53 }
 0x3db   : > { %2039 = vmatmul.mubr.f32.vlgmr.msra.gmra.mrb[32].mxu0 %v951_v55  ;;  %v953_v61 = vmax.f32 %v887_v56, 0.0 }
 0x3dc   : > { %v952_v59 = vmax.f32 %v882_v58, 0.0  ;;  %v1990_v60 = vpop.f32.mrb[20].mxu1 }
 0x3dd   : > { %v897_v62 = vadd.f32 %v1990_v60, %v1566_v48  ;;  %v891_v63 = vpop.f32.mrb[21].mxu1 }
 0x3de   : > { %v892_v0 = vadd.f32 %v1566_v48, %v891_v63  ;;  %2041 = vmatprep.mubr.f32.mxu0 %v952_v59 }
 0x3df   : > { %2042 = vmatmul.mubr.f32.gmra.mrb[34].mxu0 %v953_v61  ;;  %v955_v3 = vmax.f32 %v897_v62, 0.0 }
 0x3e0   : > { %v954_v1 = vmax.f32 %v892_v0, 0.0  ;;  %v1993_v2 = vpop.f32.mrb[22].mxu1 }
 0x3e1   : > { %v907_v4 = vadd.f32 %v1993_v2, %v1566_v48  ;;  %v901_v5 = vpop.f32.mrb[23].mxu1 }
 0x3e2   : > { %v902_v6 = vadd.f32 %v1566_v48, %v901_v5  ;;  %2044 = vmatprep.mubr.f32.mxu0 %v954_v1 }
 0x3e3   : > { %2045 = vmatmul.mubr.f32.gmra.mrb[36].mxu0 %v955_v3  ;;  %v957_v9 = vmax.f32 %v907_v4, 0.0 }
 0x3e4   : > { %v956_v7 = vmax.f32 %v902_v6, 0.0  ;;  %v1996_v8 = vpop.f32.mrb[24].mxu1 }
 0x3e5   : > { %v917_v10 = vadd.f32 %v1996_v8, %v1566_v48  ;;  %v911_v11 = vpop.f32.mrb[25].mxu1 }
 0x3e6   : > { %v912_v12 = vadd.f32 %v1566_v48, %v911_v11  ;;  %2047 = vmatprep.mubr.f32.mxu0 %v956_v7 }
 0x3e7   : > { %2048 = vmatmul.mubr.f32.gmra.mrb[38].mxu0 %v957_v9  ;;  %v959_v15 = vmax.f32 %v917_v10, 0.0 }
 0x3e8   : > { %v958_v13 = vmax.f32 %v912_v12, 0.0  ;;  %v1999_v14 = vpop.f32.mrb[26].mxu1 }
 0x3e9   : > { %v927_v16 = vadd.f32 %v1999_v14, %v1566_v48  ;;  %v921_v17 = vpop.f32.mrb[27].mxu1 }
 0x3ea   : > { %v922_v18 = vadd.f32 %v1566_v48, %v921_v17  ;;  %2050 = vmatprep.mubr.f32.mxu0 %v958_v13 }
 0x3eb   : > { %2051 = vmatmul.mubr.f32.gmra.mrb[40].mxu0 %v959_v15  ;;  %v961_v21 = vmax.f32 %v927_v16, 0.0 }
 0x3ec   : > { %v960_v19 = vmax.f32 %v922_v18, 0.0  ;;  %v2002_v20 = vpop.f32.mrb[28].mxu1 }
 0x3ed   : > { %v937_v22 = vadd.f32 %v2002_v20, %v1566_v48  ;;  %v931_v23 = vpop.f32.mrb[29].mxu1 }
 0x3ee   : > { %v932_v24 = vadd.f32 %v1566_v48, %v931_v23  ;;  %2053 = vmatprep.mubr.f32.mxu0 %v960_v19 }
 0x3ef   : > { %2054 = vmatmul.mubr.f32.gmra.mrb[42].mxu0 %v961_v21  ;;  %v963_v27 = vmax.f32 %v937_v22, 0.0  ;;  %v2749_v21 = vld [vmem:[%s2876_s2 + $0x5] ss:$0 sm:$0xff] }
 0x3f0   : > { %v962_v25 = vmax.f32 %v932_v24, 0.0  ;;  %v2005_v26 = vpop.f32.mrb[30].mxu1 }
 0x3f1   : > { %v947_v28 = vadd.f32 %v2005_v26, %v1566_v48  ;;  %v941_v29 = vpop.f32.mrb[31].mxu1 }
 0x3f2   : > { %v942_v30 = vadd.f32 %v1566_v48, %v941_v29  ;;  %2056 = vmatprep.mubr.f32.mxu0 %v962_v25 }
 0x3f3   : > { %2057 = vmatmul.mubr.f32.gmra.mrb[44].mxu0 %v963_v27  ;;  %v965_v32 = vmax.f32 %v947_v28, 0.0 }
 0x3f4   : > { %v964_v31 = vmax.f32 %v942_v30, 0.0 }
 0x3f6   : > { %2059 = vmatprep.mubr.f32.mxu0 %v964_v31 }
 0x3f7   : > { %2060 = vmatmul.mubr.f32.gmra.mrb[46].mxu0 %v965_v32 }
 0x4ae   : > { %v2040_v37 = vpop.f32.mrb[32].mxu0 }
 0x4af   : > { %v1063_v38 = vadd.f32 %v2040_v37, %v1568_v36  ;;  %v1057_v39 = vpop.f32.mrb[33].mxu0 }
 0x4b0   : > { %v1058_v40 = vadd.f32 %v1568_v36, %v1057_v39 }
 0x4b1   : > { %v1137_v43 = vmax.f32 %v1063_v38, 0.0 }
 0x4b2   : > { %v1136_v41 = vmax.f32 %v1058_v40, 0.0  ;;  %v2043_v42 = vpop.f32.mrb[34].mxu0 }
 0x4b3   : > { %v1073_v44 = vadd.f32 %v2043_v42, %v1568_v36  ;;  %v1067_v45 = vpop.f32.mrb[35].mxu0 }
 0x4b4   : > { %v1068_v46 = vadd.f32 %v1568_v36, %v1067_v45  ;;  %2094 = vmatprep.mubr.f32.mxu1 %v1136_v41 }
 0x4b5   : > { %2095 = vmatmul.mubr.f32.vlgmr.msra.gmra.mrb[32].mxu1 %v1137_v43  ;;  %v1139_v49 = vmax.f32 %v1073_v44, 0.0 }
 0x4b6   : > { %v1138_v47 = vmax.f32 %v1068_v46, 0.0  ;;  %v2046_v48 = vpop.f32.mrb[36].mxu0 }
 0x4b7   : > { %v1083_v50 = vadd.f32 %v2046_v48, %v1568_v36  ;;  %v1077_v51 = vpop.f32.mrb[37].mxu0 }
 0x4b8   : > { %v1078_v52 = vadd.f32 %v1568_v36, %v1077_v51  ;;  %2097 = vmatprep.mubr.f32.mxu1 %v1138_v47 }
 0x4b9   : > { %2098 = vmatmul.mubr.f32.gmra.mrb[34].mxu1 %v1139_v49  ;;  %v1141_v55 = vmax.f32 %v1083_v50, 0.0 }
 0x4ba   : > { %v1140_v53 = vmax.f32 %v1078_v52, 0.0  ;;  %v2049_v54 = vpop.f32.mrb[38].mxu0 }
 0x4bb   : > { %v1093_v56 = vadd.f32 %v2049_v54, %v1568_v36  ;;  %v1087_v57 = vpop.f32.mrb[39].mxu0 }
 0x4bc   : > { %v1088_v58 = vadd.f32 %v1568_v36, %v1087_v57  ;;  %2100 = vmatprep.mubr.f32.mxu1 %v1140_v53 }
 0x4bd   : > { %2101 = vmatmul.mubr.f32.gmra.mrb[36].mxu1 %v1141_v55  ;;  %v1143_v61 = vmax.f32 %v1093_v56, 0.0  ;;  %v1322_v55 = vlaneseq }
 0x4be   : > { %v1142_v59 = vmax.f32 %v1088_v58, 0.0  ;;  %v2052_v60 = vpop.f32.mrb[40].mxu0 }
 0x4bf   : > { %v1103_v62 = vadd.f32 %v2052_v60, %v1568_v36  ;;  %v1097_v63 = vpop.f32.mrb[41].mxu0 }
 0x4c0   : > { %v1098_v0 = vadd.f32 %v1568_v36, %v1097_v63  ;;  %2103 = vmatprep.mubr.f32.mxu1 %v1142_v59 }
 0x4c1   : > { %2104 = vmatmul.mubr.f32.gmra.mrb[38].mxu1 %v1143_v61  ;;  %v1145_v3 = vmax.f32 %v1103_v62, 0.0 }
 0x4c2   : > { %v1144_v1 = vmax.f32 %v1098_v0, 0.0  ;;  %v2055_v2 = vpop.f32.mrb[42].mxu0 }
 0x4c3   : > { %v1113_v4 = vadd.f32 %v2055_v2, %v1568_v36  ;;  %v1107_v5 = vpop.f32.mrb[43].mxu0 }
 0x4c4   : > { %v1108_v6 = vadd.f32 %v1568_v36, %v1107_v5  ;;  %2106 = vmatprep.mubr.f32.mxu1 %v1144_v1 }
 0x4c5   : > { %2107 = vmatmul.mubr.f32.gmra.mrb[40].mxu1 %v1145_v3  ;;  %v1147_v9 = vmax.f32 %v1113_v4, 0.0  ;;  %v2772_v4 = vand.u32 127, %v1322_v55 }
 0x4c6   : > { %v1146_v7 = vmax.f32 %v1108_v6, 0.0  ;;  %v2058_v8 = vpop.f32.mrb[44].mxu0 }
 0x4c7   : > { %v1123_v10 = vadd.f32 %v2058_v8, %v1568_v36  ;;  %v1117_v11 = vpop.f32.mrb[45].mxu0  ;;  %vm1324_vm0 = vcmp.eq.s32.totalorder %v2772_v4, 0 }
 0x4c8   : > { %v1118_v12 = vadd.f32 %v1568_v36, %v1117_v11  ;;  %2109 = vmatprep.mubr.f32.mxu1 %v1146_v7 }
 0x4c9   : > { %2110 = vmatmul.mubr.f32.gmra.mrb[42].mxu1 %v1147_v9  ;;  %v1149_v15 = vmax.f32 %v1123_v10, 0.0 }
 0x4ca   : > { %v1148_v13 = vmax.f32 %v1118_v12, 0.0  ;;  %v2061_v14 = vpop.f32.mrb[46].mxu0 }
 0x4cb   : > { %v1133_v16 = vadd.f32 %v2061_v14, %v1568_v36  ;;  %v1127_v17 = vpop.f32.mrb[47].mxu0 }
 0x4cc   : > { %v1128_v18 = vadd.f32 %v1568_v36, %v1127_v17  ;;  %2112 = vmatprep.mubr.f32.mxu1 %v1148_v13 }
 0x4cd   : > { %2113 = vmatmul.mubr.f32.gmra.mrb[44].mxu1 %v1149_v15  ;;  %v1151_v20 = vmax.f32 %v1133_v16, 0.0 }
 0x4ce   : > { %v1150_v19 = vmax.f32 %v1128_v18, 0.0 }
 0x4d0   : > { %2115 = vmatprep.mubr.f32.mxu1 %v1150_v19 }
 0x4d1   : > { %2116 = vmatmul.mubr.f32.gmra.mrb[46].mxu1 %v1151_v20 }
 0x588   : > { %v2096_v22 = vpop.f32.mrb[32].mxu1 }
 0x589   : > { %v1249_v23 = vadd.f32 %v2096_v22, %v2749_v21  ;;  %v1243_v24 = vpop.f32.mrb[33].mxu1 }
 0x58a   : > { %v1244_v25 = vadd.f32 %v2749_v21, %v1243_v24 }
 0x58b   : > { %v1572_v26 = vmul.f32 -1.442695, %v1249_v23 }
 0x58c   : > { %v1571_v27 = vmul.f32 -1.442695, %v1244_v25  ;;  %v2099_v28 = vpop.f32.mrb[34].mxu1 }
 0x58d   : > { %2362 = vpow2.f32 %v1572_v26  ;;  %v1259_v29 = vadd.f32 %v2099_v28, %v2749_v21  ;;  %v1253_v30 = vpop.f32.mrb[35].mxu1 }
 0x58e   : > { %2364 = vpow2.f32 %v1571_v27  ;;  %v1254_v31 = vadd.f32 %v2749_v21, %v1253_v30 }
 0x58f   : > { %2366 = vtanh.f32 %v1249_v23  ;;  %v1574_v32 = vmul.f32 -1.442695, %v1259_v29 }
 0x590   : > { %2368 = vtanh.f32 %v1244_v25  ;;  %v1573_v33 = vmul.f32 -1.442695, %v1254_v31  ;;  %v2102_v34 = vpop.f32.mrb[36].mxu1 }
 0x591   : > { %2370 = vpow2.f32 %v1574_v32  ;;  %v1269_v35 = vadd.f32 %v2102_v34, %v2749_v21  ;;  %v1263_v36 = vpop.f32.mrb[37].mxu1 }
 0x592   : > { %2372 = vpow2.f32 %v1573_v33  ;;  %v1264_v37 = vadd.f32 %v2749_v21, %v1263_v36 }
 0x593   : > { %2374 = vtanh.f32 %v1259_v29  ;;  %v1576_v38 = vmul.f32 -1.442695, %v1269_v35 }
 0x594   : > { %2376 = vtanh.f32 %v1254_v31  ;;  %v1575_v39 = vmul.f32 -1.442695, %v1264_v37  ;;  %v2105_v40 = vpop.f32.mrb[38].mxu1 }
 0x595   : > { %2378 = vpow2.f32 %v1576_v38  ;;  %v1279_v41 = vadd.f32 %v2105_v40, %v2749_v21  ;;  %v1273_v42 = vpop.f32.mrb[39].mxu1 }
 0x596   : > { %2380 = vpow2.f32 %v1575_v39  ;;  %v1274_v43 = vadd.f32 %v2749_v21, %v1273_v42 }
 0x597   : > { %v2363_v44 = vpop.eup %2362  ;;  %2382 = vtanh.f32 %v1269_v35  ;;  %v1578_v45 = vmul.f32 -1.442695, %v1279_v41 }
 0x598   : > { %v2365_v46 = vpop.eup %2364  ;;  %v1374_v47 = vadd.f32 1.0, %v2363_v44  ;;  %2384 = vtanh.f32 %v1264_v37  ;;  %v1577_v48 = vmul.f32 -1.442695, %v1274_v43  ;;  %v2108_v49 = vpop.f32.mrb[40].mxu1 }
 0x599   : > { %v2367_v50 = vpop.eup %2366  ;;  %v1373_v51 = vadd.f32 1.0, %v2365_v46  ;;  %2386 = vpow2.f32 %v1578_v45  ;;  %v1289_v52 = vadd.f32 %v2108_v49, %v2749_v21  ;;  %v1283_v53 = vpop.f32.mrb[41].mxu1 }
 0x59a   : > { %v2369_v54 = vpop.eup %2368  ;;  %2388 = vrcp.f32 %v1374_v47  ;;  %v2763_v56 = vadd.f32 %v2749_v21, %v1283_v53 }
 0x59b   : > { %v2371_v57 = vpop.eup %2370  ;;  %2390 = vrcp.f32 %v1373_v51  ;;  %v1580_v58 = vmul.f32 -1.442695, %v1289_v52 }
 0x59c   : > { %v2373_v59 = vpop.eup %2372  ;;  %v1376_v60 = vadd.f32 1.0, %v2371_v57  ;;  %2392 = vpow2.f32 %v1577_v48  ;;  %v2111_v61 = vpop.f32.mrb[42].mxu1  ;;  %v1579_v0 = vmul.f32 -1.442695, %v2763_v56 }
 0x59d   : > { %v2375_v62 = vpop.eup %2374  ;;  %v1375_v63 = vadd.f32 1.0, %v2373_v59  ;;  %2394 = vpow2.f32 %v1580_v58  ;;  %v2770_v1 = vadd.f32 %v2111_v61, %v2749_v21  ;;  %v1293_v2 = vpop.f32.mrb[43].mxu1 }
 0x59e   : > { %v2377_v3 = vpop.eup %2376  ;;  %2396 = vrcp.f32 %v1376_v60  ;;  %v2776_v8 = vadd.f32 %v2749_v21, %v1293_v2 }
 0x59f   : > { %v2379_v5 = vpop.eup %2378  ;;  %2398 = vrcp.f32 %v1375_v63  ;;  %v1582_v12 = vmul.f32 -1.442695, %v2770_v1 }
 0x5a0   : > { %v2381_v6 = vpop.eup %2380  ;;  %v1378_v7 = vadd.f32 1.0, %v2379_v5  ;;  %2400 = vtanh.f32 %v1279_v41  ;;  %v2114_v9 = vpop.f32.mrb[44].mxu1  ;;  %v1581_v18 = vmul.f32 -1.442695, %v2776_v8 }
 0x5a1   : > { %v2383_v10 = vpop.eup %2382  ;;  %v1377_v11 = vadd.f32 1.0, %v2381_v6  ;;  %2402 = vpow2.f32 %v1579_v0  ;;  %v1303_v13 = vpop.f32.mrb[45].mxu1  ;;  %v2787_v19 = vadd.f32 %v2114_v9, %v2749_v21 }
 0x5a2   : > { %v2385_v14 = vpop.eup %2384  ;;  %2404 = vrcp.f32 %v1378_v7  ;;  %v1304_v29 = vadd.f32 %v2749_v21, %v1303_v13 }
 0x5a3   : > { %v2387_v15 = vpop.eup %2386  ;;  %2406 = vrcp.f32 %v1377_v11  ;;  %v1584_v32 = vmul.f32 -1.442695, %v2787_v19 }
 0x5a4   : > { %v2389_v16 = vpop.eup %2388  ;;  %v1380_v17 = vadd.f32 1.0, %v2387_v15  ;;  %2408 = vtanh.f32 %v1274_v43  ;;  %v2117_v20 = vpop.f32.mrb[46].mxu1  ;;  %v1583_v39 = vmul.f32 -1.442695, %v1304_v29 }
 0x5a5   : > { %v2391_v22 = vpop.eup %2390  ;;  %v1438_v23 = vsel %vm1324_vm0, %v2389_v16, %v2367_v50  ;;  %2410 = vpow2.f32 %v1582_v12  ;;  %v1313_v24 = vpop.f32.mrb[47].mxu1  ;;  %v1319_v35 = vadd.f32 %v2117_v20, %v2749_v21 }
 0x5a6   : > { %v2393_v25 = vpop.eup %2392  ;;  %1455 = vst.msk [vmem:[%s2783_s20 + $0x8] sm:$0xff] %vm1453_vm1, %v1438_v23  ;;  %v1437_v26 = vsel %vm1324_vm0, %v2391_v22, %v2369_v54  ;;  %2412 = vrcp.f32 %v1380_v17  ;;  %v1314_v42 = vadd.f32 %v2749_v21, %v1313_v24 }
 0x5a7   : > { %v2395_v27 = vpop.eup %2394  ;;  %1454 = vst.msk [vmem:[%s2783_s20] sm:$0xff] %vm1453_vm1, %v1437_v26  ;;  %v1379_v28 = vadd.f32 1.0, %v2393_v25  ;;  %2414 = vtanh.f32 %v1289_v52  ;;  %v1586_v45 = vmul.f32 -1.442695, %v1319_v35 }
 0x5a8   : > { %v2397_v30 = vpop.eup %2396  ;;  %v1382_v31 = vadd.f32 1.0, %v2395_v27  ;;  %2416 = vpow2.f32 %v1581_v18  ;;  %v1585_v50 = vmul.f32 -1.442695, %v1314_v42 }
 0x5a9   : > { %v2399_v33 = vpop.eup %2398  ;;  %v1440_v34 = vsel %vm1324_vm0, %v2397_v30, %v2375_v62  ;;  %2418 = vrcp.f32 %v1379_v28 }
 0x5aa   : > { %v2401_v36 = vpop.eup %2400  ;;  %1457 = vst.msk [vmem:[%s2783_s20 + $0x18] sm:$0xff] %vm1453_vm1, %v1440_v34  ;;  %v1439_v37 = vsel %vm1324_vm0, %v2399_v33, %v2377_v3  ;;  %2420 = vrcp.f32 %v1382_v31 }
 0x5ab   : > { %v2403_v38 = vpop.eup %2402  ;;  %1456 = vst.msk [vmem:[%s2783_s20 + $0x10] sm:$0xff] %vm1453_vm1, %v1439_v37  ;;  %2422 = vpow2.f32 %v1584_v32 }
 0x5ac   : > { %v2405_v40 = vpop.eup %2404  ;;  %v1381_v41 = vadd.f32 1.0, %v2403_v38  ;;  %2424 = vtanh.f32 %v2763_v56 }
 0x5ad   : > { %v2407_v43 = vpop.eup %2406  ;;  %v1442_v44 = vsel %vm1324_vm0, %v2405_v40, %v2383_v10 }
 0x5ae   : > { %v2409_v46 = vpop.eup %2408  ;;  %1459 = vst.msk [vmem:[%s2783_s20 + $0x28] sm:$0xff] %vm1453_vm1, %v1442_v44  ;;  %v1441_v47 = vsel %vm1324_vm0, %v2407_v43, %v2385_v14  ;;  %2426 = vrcp.f32 %v1381_v41 }
 0x5af   : > { %v2411_v48 = vpop.eup %2410  ;;  %1458 = vst.msk [vmem:[%s2783_s20 + $0x20] sm:$0xff] %vm1453_vm1, %v1441_v47  ;;  %2428 = vpow2.f32 %v1583_v39 }
 0x5b0   : > { %v2413_v21 = vpop.eup %2412  ;;  %v1384_v49 = vadd.f32 1.0, %v2411_v48  ;;  %2430 = vtanh.f32 %v2770_v1 }
 0x5b1   : > { %v2415_v51 = vpop.eup %2414  ;;  %v1444_v52 = vsel %vm1324_vm0, %v2413_v21, %v2401_v36  ;;  %2432 = vpow2.f32 %v1586_v45 }
 0x5b2   : > { %v2417_v53 = vpop.eup %2416  ;;  %1461 = vst.msk [vmem:[%s2783_s20 + $0x38] sm:$0xff] %vm1453_vm1, %v1444_v52  ;;  %2434 = vrcp.f32 %v1384_v49 }
 0x5b3   : > { %v2419_v54 = vpop.eup %2418  ;;  %v1383_v55 = vadd.f32 1.0, %v2417_v53  ;;  %2436 = vtanh.f32 %v2776_v8 }
 0x5b4   : > { %v2421_v56 = vpop.eup %2420  ;;  %v1443_v57 = vsel %vm1324_vm0, %v2419_v54, %v2409_v46  ;;  %2438 = vpow2.f32 %v1585_v50 }
 0x5b5   : > { %1460 = vst.msk [vmem:[%s2783_s20 + $0x30] sm:$0xff] %vm1453_vm1, %v1443_v57  ;;  %v1446_v58 = vsel %vm1324_vm0, %v2421_v56, %v2415_v51  ;;  %2440 = vrcp.f32 %v1383_v55  ;;  %v2423_v59 = vpop.eup %2422 }
 0x5b6   : > { %1463 = vst.msk [vmem:[%s2783_s20 + $0x48] sm:$0xff] %vm1453_vm1, %v1446_v58  ;;  %v2425_v60 = vpop.eup %2424  ;;  %v1386_v61 = vadd.f32 1.0, %v2423_v59  ;;  %2442 = vtanh.f32 %v2787_v19 }
 0x5b8   : > { %v2427_v62 = vpop.eup %2426  ;;  %2444 = vrcp.f32 %v1386_v61 }
 0x5b9   : > { %v2429_v63 = vpop.eup %2428  ;;  %v1445_v0 = vsel %vm1324_vm0, %v2427_v62, %v2425_v60  ;;  %2446 = vtanh.f32 %v1304_v29 }
 0x5ba   : > { %v2431_v1 = vpop.eup %2430  ;;  %1462 = vst.msk [vmem:[%s2783_s20 + $0x40] sm:$0xff] %vm1453_vm1, %v1445_v0  ;;  %v1385_v2 = vadd.f32 1.0, %v2429_v63 }
 0x5bb   : > { %v2433_v3 = vpop.eup %2432 }
 0x5bc   : > { %v2435_v5 = vpop.eup %2434  ;;  %2448 = vrcp.f32 %v1385_v2  ;;  %v1388_v6 = vadd.f32 1.0, %v2433_v3 }
 0x5bd   : > { %v2437_v7 = vpop.eup %2436  ;;  %v1448_v8 = vsel %vm1324_vm0, %v2435_v5, %v2431_v1  ;;  %2450 = vtanh.f32 %v1319_v35 }
 0x5be   : > { %v2439_v9 = vpop.eup %2438  ;;  %1465 = vst.msk [vmem:[%s2783_s20 + $0x58] sm:$0xff] %vm1453_vm1, %v1448_v8  ;;  %2452 = vrcp.f32 %v1388_v6 }
 0x5bf   : > { %v2441_v10 = vpop.eup %2440  ;;  %v1387_v11 = vadd.f32 1.0, %v2439_v9  ;;  %2454 = vtanh.f32 %v1314_v42 }
 0x5c0   : > { %v1447_v12 = vsel %vm1324_vm0, %v2441_v10, %v2437_v7  ;;  %v2443_v13 = vpop.eup %2442 }
 0x5c1   : > { %1464 = vst.msk [vmem:[%s2783_s20 + $0x50] sm:$0xff] %vm1453_vm1, %v1447_v12  ;;  %2456 = vrcp.f32 %v1387_v11 }
 0x5c2   : > { %v2445_v14 = vpop.eup %2444 }
 0x5c3   : > { %v1450_v15 = vsel %vm1324_vm0, %v2445_v14, %v2443_v13  ;;  %v2447_v16 = vpop.eup %2446 }
 0x5c4   : > { %1467 = vst.msk [vmem:[%s2783_s20 + $0x68] sm:$0xff] %vm1453_vm1, %v1450_v15 }
 0x5c6   : > { %v2449_v17 = vpop.eup %2448 }
 0x5c7   : > { %v2451_v18 = vpop.eup %2450  ;;  %v1449_v19 = vsel %vm1324_vm0, %v2449_v17, %v2447_v16 }
 0x5c8   : > { %v2453_v20 = vpop.eup %2452  ;;  %1466 = vst.msk [vmem:[%s2783_s20 + $0x60] sm:$0xff] %vm1453_vm1, %v1449_v19 }
 0x5c9   : > { %v1452_v22 = vsel %vm1324_vm0, %v2453_v20, %v2451_v18  ;;  %v2455_v23 = vpop.eup %2454 }
 0x5ca   : > { %1469 = vst.msk [vmem:[%s2783_s20 + $0x78] sm:$0xff] %vm1453_vm1, %v1452_v22 }
 0x5cb   : > { %v2457_v24 = vpop.eup %2456 }
 0x5cc   : > { %v1451_v25 = vsel %vm1324_vm0, %v2457_v24, %v2455_v23 }
 0x5cd   : > { %1468 = vst.msk [vmem:[%s2783_s20 + $0x70] sm:$0xff] %vm1453_vm1, %v1451_v25 }
 0x5ce PF: > { %p14_p6 = scmp.ge.s32.totalorder %s2627_s23, 4   ;;  %s2890_s12 = smov %s2546_s13 }
 0x5cf   : > { %s2891_s13 = smov %s2550_s14  ;;  %s2892_s14 = smov %s2656_s11 }
 0x5d0   : > { %s2893_s15 = smov %s2627_s23  ;;  %16 = sbr.rel (!%p14_p6) target bundleno = 4 (0x4), region = 86 }
 0x5d7   :  { %1492 = vsyncpa [#allocation3], 1 }
 0x5d8   :  { %1494 = vsyncpa [#allocation3 + $0x1], 1 }
 0x5d9   :  { %1495 = vsyncpa [#allocation5], 1 }

</bundles_post_ra>
